<compile_context>
chip_gen: v7x
topology: tpu7x:2x2x1
jax: 0.10.0
libtpu: 0.0.40
codegen_flags: <defaults>
</compile_context>

<pallas_src>
import jax
import jax.numpy as jnp
from jax.experimental import pallas as pl
from jax.experimental.pallas import tpu as pltpu

IN_FEATURES = 10
OUT_FEATURES = 1
_LANE = 128


def linear_kernel(x_ref, w_ref, b_ref, o_ref):
    # x_ref: (tile_b, IN)  f32, native row-major batch tile
    # w_ref: (1, IN)       f32, lane-resident weight row
    # b_ref: (1,)          f32, scalar in SMEM
    # o_ref: (tile_b, 1)   f32
    prod = x_ref[...] * w_ref[...]                    # VPU; weight row sublane-replicated
    red = jnp.sum(prod, axis=1, keepdims=True)        # XLU lane reduce over the 10 features
    o_ref[...] = (red + b_ref[0]).astype(o_ref.dtype)  # (tile_b, 1) writeback


def simple_net_forward(x, w, b, *, tile_b=8192, min_pallas_batch=1024):
    """SimpleNet forward: y = x @ w.T + b.

    x: (B, IN_FEATURES); w: (OUT_FEATURES, IN_FEATURES); b: (OUT_FEATURES,).
    Returns (B, OUT_FEATURES) in x.dtype.
    """
    B = x.shape[0]
    assert x.shape == (B, IN_FEATURES)
    w_f = w.reshape(OUT_FEATURES, IN_FEATURES).astype(jnp.float32)
    b_f = b.reshape(OUT_FEATURES).astype(jnp.float32)

    # Small-batch fallback: pallas dispatch overhead swamps ~20 FLOPs per row.
    if B < max(min_pallas_batch, 2 * _LANE):
        return (x.astype(jnp.float32) @ w_f.T + b_f).astype(x.dtype)

    # Lane-aligned tile, capped so the grid keeps >= 2 steps (v7x megacore).
    two_tile_cap = max(_LANE, ((B // 2) // _LANE) * _LANE)
    tile_b = max(_LANE, min(int(tile_b), two_tile_cap))
    num_tiles = pl.cdiv(B, tile_b)   # ragged final tile handled by Pallas masking

    out = pl.pallas_call(
        linear_kernel,
        out_shape=jax.ShapeDtypeStruct((B, OUT_FEATURES), jnp.float32),
        grid=(num_tiles,),
        in_specs=[
            # x in native layout: one contiguous (tile_b, 10) slab per step,
            # single HBM pass over the activations.
            pl.BlockSpec((tile_b, IN_FEATURES), lambda i: (i, 0)),
            # weight row: full-extent block, same block index every step.
            pl.BlockSpec((OUT_FEATURES, IN_FEATURES), lambda i: (0, 0)),
            # bias scalar lives in SMEM (no padded VMEM tile).
            pl.BlockSpec(memory_space=pltpu.MemorySpace.SMEM),
        ],
        # (tile_b, 1): sublane dim multiple of 8, lane dim == full array extent.
        out_specs=pl.BlockSpec((tile_b, OUT_FEATURES), lambda i: (i, 0)),
        compiler_params=pltpu.CompilerParams(
            # Independent batch tiles -> shard across TensorCores on v7x.
            dimension_semantics=("parallel",),
            # VMEM footprint ~2 x 320 KiB: no vmem_limit_bytes needed on any gen.
        ),
    )(x.astype(jnp.float32), w_f, b_f)

    return out.astype(x.dtype)


def init_params(key):
    # nn.Linear default init: U(-1/sqrt(in), 1/sqrt(in)).
    kw, kb = jax.random.split(key)
    bound = 1.0 / (IN_FEATURES ** 0.5)
    w = jax.random.uniform(kw, (OUT_FEATURES, IN_FEATURES), jnp.float32, -bound, bound)
    b = jax.random.uniform(kb, (OUT_FEATURES,), jnp.float32, -bound, bound)
    return w, b


if __name__ == "__main__":
    key = jax.random.PRNGKey(0)
    k_small, k_big, k_p = jax.random.split(key, 3)
    w, b = init_params(k_p)

    # Small batch (PyTorch-typical): routed through the fused XLA fallback.
    x_small = jax.random.normal(k_small, (8, IN_FEATURES), jnp.float32)
    y_small = jax.block_until_ready(simple_net_forward(x_small, w, b))
    assert y_small.shape == (8, OUT_FEATURES)
    assert jnp.allclose(y_small, x_small @ w.T + b, atol=1e-5, rtol=1e-5)

    # Batch large enough for the Pallas path: 3 grid steps, ragged last tile,
    # >= 2 tiles so a v7x megacore split is exercised.
    B = 2309
    x_big = jax.random.normal(k_big, (B, IN_FEATURES), jnp.float32)
    y_big = jax.block_until_ready(simple_net_forward(x_big, w, b))
    assert y_big.shape == (B, OUT_FEATURES)
    assert jnp.allclose(y_big, x_big @ w.T + b, atol=1e-5, rtol=1e-5)

    print("KERNEL_OK")
</pallas_src>

<mosaic_0001>
module attributes {stable_mosaic.version = 11 : i64} {
  func.func @linear_kernel(%arg0: i32, %arg1: memref<1152x10xf32, #tpu.memory_space<vmem>>, %arg2: memref<1x10xf32, #tpu.memory_space<vmem>>, %arg3: memref<1xf32, #tpu.memory_space<smem>>, %arg4: memref<1152x1xf32, #tpu.memory_space<vmem>>) attributes {dimension_semantics = [#tpu.dimension_semantics<parallel>], iteration_bounds = array<i64: 3>, scalar_prefetch = 0 : i64, scratch_operands = 0 : i64, tpu.core_type = #tpu.core_type<tc>, window_params = [{transform_indices = @transform_0, window_bounds = array<i64: 1152, 10>}, {pipeline_mode = #tpu.pipeline_mode<synchronous>, transform_indices = @transform_1, window_bounds = array<i64: 1, 10>}, {transform_indices = @transform_2, window_bounds = array<i64: 1>}, {transform_indices = @transform_3, window_bounds = array<i64: 1152, 1>}]} {
    %c0 = arith.constant 0 : index
    %c0_0 = arith.constant 0 : index
    %0 = vector.load %arg1[%c0, %c0_0] : memref<1152x10xf32, #tpu.memory_space<vmem>>, vector<1152x10xf32>
    %c0_1 = arith.constant 0 : index
    %c0_2 = arith.constant 0 : index
    %1 = vector.load %arg2[%c0_1, %c0_2] : memref<1x10xf32, #tpu.memory_space<vmem>>, vector<1x10xf32>
    %2 = vector.broadcast %1 : vector<1x10xf32> to vector<1152x10xf32>
    %3 = arith.mulf %0, %2 : vector<1152x10xf32>
    %cst = arith.constant dense<0.000000e+00> : vector<1152xf32>
    %4 = vector.multi_reduction <add>, %3, %cst [1] : vector<1152x10xf32> to vector<1152xf32>
    %5 = vector.shape_cast %4 : vector<1152xf32> to vector<1152x1xf32>
    %c0_3 = arith.constant 0 : index
    %6 = memref.load %arg3[%c0_3] : memref<1xf32, #tpu.memory_space<smem>>
    %7 = vector.broadcast %6 : f32 to vector<1152x1xf32>
    %8 = arith.addf %5, %7 : vector<1152x1xf32>
    %c0_4 = arith.constant 0 : index
    %c0_5 = arith.constant 0 : index
    %9 = vector.load %arg4[%c0_4, %c0_5] : memref<1152x1xf32, #tpu.memory_space<vmem>>, vector<1152x1xf32>
    tpu.vector_store %arg4[%c0_4, %c0_5], %8 {strides = array<i32>} : memref<1152x1xf32, #tpu.memory_space<vmem>>, vector<1152x1xf32>,
    return
  }
  func.func @transform_0(%arg0: i32) -> (i32, i32) {
    %c0_i32 = arith.constant 0 : i32
    %c0_i32_0 = arith.constant 0 : i32
    return %arg0, %c0_i32 : i32, i32
  }
  func.func @transform_1(%arg0: i32) -> (i32, i32) {
    %c0_i32 = arith.constant 0 : i32
    %c0_i32_0 = arith.constant 0 : i32
    %c0_i32_1 = arith.constant 0 : i32
    return %c0_i32, %c0_i32_0 : i32, i32
  }
  func.func @transform_2(%arg0: i32) -> i32 {
    %c0_i32 = arith.constant 0 : i32
    %c0_i32_0 = arith.constant 0 : i32
    return %c0_i32 : i32
  }
  func.func @transform_3(%arg0: i32) -> (i32, i32) {
    %c0_i32 = arith.constant 0 : i32
    %c0_i32_0 = arith.constant 0 : i32
    return %arg0, %c0_i32 : i32, i32
  }
}

</mosaic_0001>

<bundles_post_ra>
// kernel: tpu_custom_call.1
= control target key start
LH: loop header
LB: loop body
LE: loop exit
PB: predicated region body
PF: predicated region fallthrough
CT: control target
= control target key end

     0   :  { %s3028_s0 = inlined_call_operand.vmem [shape: f32[2309,10], index: 0, kind: input, shape index: {}]   ;;  %s3029_s1 = inlined_call_operand.vmem [shape: f32[1,10], index: 1, kind: input, shape index: {}]   ;;  %s3030_s2 = inlined_call_operand.<no memory space> [shape: f32[1], index: 2, kind: input, shape index: {}]   ;;  %s3031_s3 = inlined_call_operand.vmem [shape: f32[2309,1], index: 3, kind: output, shape index: {}]  }
   0x1   :  { %8 = sst [smem:[#allocation2]] %s3030_s2 }
   0x2   :  { %s1904_s14 = smov 0   ;;  %s1906_s15 = smov 0  }
   0x3   :  { %s1908_s16 = smov 0  }
   0x4 LB: > { %s1917_s2 = sadd.s32 4294967295, %s1847_s16   ;;  %s1919_s17 = sadd.s32 1, %s1847_s16   ;;  %s1847_s16 = sphi %s1908_s16, %s3040_s16   ;;  %s1843_s15 = sphi %s1906_s15, %s3039_s15   ;;  %s1839_s14 = sphi %s1904_s14, %s3038_s14  }
   0x5   : > { %s86_s18 = ssub.s32 %s1847_s16, %s1919_s17  ;;  %s89_s19 = sadd.s32 1, %s1843_s15 }
   0x6   : > { %p87_p0 = scmp.eq.s32.totalorder %s86_s18, 0  ;;  %p99_p1 = scmp.ne.s32.totalorder %s1843_s15, %s1839_s14 }
   0x7   : > { %p100_p2 = scmp.eq.s32.totalorder %s1917_s2, 2  ;;  %p1682_p3 = scmp.ge.s32.totalorder %s1847_s16, 1 }
   0x8   : > { %s1927_s20 = scalar_select %p87_p0, %s1843_s15, %s89_s19  }
   0x9   : > { %p1929_p4 = por %p100_p2, %p99_p1  ;;  %p147_p5 = scmp.lt.s32.totalorder %s1847_s16, 4 }
   0xb   : > { %p148_p6 = pnand %p1682_p3, %p147_p5 }
   0xc   : > { %s1934_s22 = smul.u32 (!%p148_p6), 144, %s1917_s2  ;;  %v1941_v0 = vld [vmem:[%s3029_s1] ss:$0 sm:$0xff] (!%p148_p6)  ;;  %vm488_vm0 = vcmask (!%p148_p6), 80896   ;;  %s921_s30 = sld [smem:[#allocation2]] (!%p148_p6)  ;;  %vm1067_vm1 = vcmask (!%p148_p6), 7168  }
   0xd   : > { %151 = sbr.rel (%p148_p6) target bundleno = 529 (0x211), region = 32  ;;  %s171_s4 = sand.u32 (!%p148_p6), 1, %s1839_s14  }
   0xe   : > { %p179_p7 = scmp.lt.s32.totalorder (!%p148_p6), %s1934_s22, 288  ;;  %s1703_s5 = smul.u32 (!%p148_p6), 1152, %s171_s4 }
  0x10   : > { %s2181_s6 = scalar_lea.vmem (!%p148_p6), [#allocation3], %s1703_s5  }
  0x14   : > { %s180_s23 = scalar_select %p179_p7, %s1934_s22, 288 }
  0x15   : > { %s1220_s9 = ssub.s32 (%p1929_p4), 289, %s1934_s22  ;;  %s1700_s10 = smul.u32 (%p1929_p4), 1152, %s1917_s2 }
  0x16   : > { %s1683_s24 = sshll.u32 %s180_s23, 3  ;;  %p1221_p8 = scmp.lt.s32.totalorder (%p1929_p4), %s1220_s9, 144 }
  0x17   : > { %s1946_s29 = scalar_lea.vmem %s3028_s0, %s1683_s24  ;;  %s2829_s13 = scalar_lea.vmem (%p1929_p4), %s3031_s3, %s1700_s10  }
  0x18   : > { %v195_v1 = vld [vmem:[%s1946_s29 + $0x10] sm:$0xff]  ;;  %v193_v2 = vld [vmem:[%s1946_s29] sm:$0xff]  ;;  %v196_v3 = vld [vmem:[%s1946_s29 + $0x18] sm:$0xff] }
  0x19   : > { %v346_v4 = vmul.f32 %v1941_v0, %v195_v1  ;;  %v344_v5 = vmul.f32 %v1941_v0, %v193_v2  ;;  %v347_v6 = vmul.f32 %v1941_v0, %v196_v3  ;;  %v194_v7 = vld [vmem:[%s1946_s29 + $0x8] sm:$0xff]  ;;  %v197_v10 = vld [vmem:[%s1946_s29 + $0x20] sm:$0xff]  ;;  %v200_v17 = vld [vmem:[%s1946_s29 + $0x38] sm:$0xff] }
  0x1a   : > { %v345_v8 = vmul.f32 %v1941_v0, %v194_v7  ;;  %v198_v9 = vld [vmem:[%s1946_s29 + $0x28] sm:$0xff]  ;;  %v348_v16 = vmul.f32 %v1941_v0, %v197_v10  ;;  %v199_v18 = vld [vmem:[%s1946_s29 + $0x30] sm:$0xff]  ;;  %v351_v21 = vmul.f32 %v1941_v0, %v200_v17  ;;  %v201_v24 = vld [vmem:[%s1946_s29 + $0x40] sm:$0xff] }
  0x1b   : > { %v495_v11 = vsel %vm488_vm0, %v346_v4, 0.0  ;;  %v489_v12 = vsel %vm488_vm0, %v344_v5, 0.0  ;;  %v498_v13 = vsel %vm488_vm0, %v347_v6, 0.0  ;;  %v349_v15 = vmul.f32 %v1941_v0, %v198_v9  ;;  %v202_v23 = vld [vmem:[%s1946_s29 + $0x48] sm:$0xff]  ;;  %v204_v29 = vld [vmem:[%s1946_s29 + $0x58] sm:$0xff]  ;;  %v203_v30 = vld [vmem:[%s1946_s29 + $0x50] sm:$0xff] }
  0x1c   : > { %496 = vadd.xlane.f32.xlu1 %v495_v11  ;;  %490 = vadd.xlane.f32.xlu0 %v489_v12  ;;  %v492_v14 = vsel %vm488_vm0, %v345_v8, 0.0  ;;  %v501_v20 = vsel %vm488_vm0, %v348_v16, 0.0  ;;  %v350_v22 = vmul.f32 %v1941_v0, %v199_v18  ;;  %v510_v25 = vsel %vm488_vm0, %v351_v21, 0.0  ;;  %v206_v35 = vld [vmem:[%s1946_s29 + $0x68] sm:$0xff]  ;;  %v205_v36 = vld [vmem:[%s1946_s29 + $0x60] sm:$0xff]  ;;  %v208_v41 = vld [vmem:[%s1946_s29 + $0x78] sm:$0xff] }
  0x1d   : > { %v504_v19 = vsel %vm488_vm0, %v349_v15, 0.0  ;;  %v353_v27 = vmul.f32 %v1941_v0, %v202_v23  ;;  %v352_v28 = vmul.f32 %v1941_v0, %v201_v24  ;;  %v355_v33 = vmul.f32 %v1941_v0, %v204_v29  ;;  %v207_v42 = vld [vmem:[%s1946_s29 + $0x70] sm:$0xff]  ;;  %v210_v47 = vld [vmem:[%s1946_s29 + $0x88] sm:$0xff]  ;;  %v209_v48 = vld [vmem:[%s1946_s29 + $0x80] sm:$0xff] }
  0x1e   : > { %v507_v26 = vsel %vm488_vm0, %v350_v22, 0.0  ;;  %v354_v34 = vmul.f32 %v1941_v0, %v203_v30  ;;  %v357_v39 = vmul.f32 %v1941_v0, %v206_v35  ;;  %v356_v40 = vmul.f32 %v1941_v0, %v205_v36  ;;  %v212_v53 = vld [vmem:[%s1946_s29 + $0x98] sm:$0xff]  ;;  %v211_v54 = vld [vmem:[%s1946_s29 + $0x90] sm:$0xff]  ;;  %v214_v59 = vld [vmem:[%s1946_s29 + $0xa8] sm:$0xff] }
  0x1f   : > { %v516_v31 = vsel %vm488_vm0, %v353_v27, 0.0  ;;  %v513_v32 = vsel %vm488_vm0, %v352_v28, 0.0  ;;  %v522_v37 = vsel %vm488_vm0, %v355_v33, 0.0  ;;  %v359_v45 = vmul.f32 %v1941_v0, %v208_v41  ;;  %v213_v60 = vld [vmem:[%s1946_s29 + $0xa0] sm:$0xff]  ;;  %v216_v2 = vld [vmem:[%s1946_s29 + $0xb8] sm:$0xff]  ;;  %v215_v3 = vld [vmem:[%s1946_s29 + $0xb0] sm:$0xff] }
  0x20   : > { %499 = vadd.xlane.f32.xlu1 %v498_v13  ;;  %493 = vadd.xlane.f32.xlu0 %v492_v14  ;;  %v519_v38 = vsel %vm488_vm0, %v354_v34, 0.0  ;;  %v528_v43 = vsel %vm488_vm0, %v357_v39, 0.0  ;;  %v525_v44 = vsel %vm488_vm0, %v356_v40, 0.0  ;;  %v358_v46 = vmul.f32 %v1941_v0, %v207_v42  ;;  %v218_v8 = vld [vmem:[%s1946_s29 + $0xc8] sm:$0xff]  ;;  %v217_v9 = vld [vmem:[%s1946_s29 + $0xc0] sm:$0xff]  ;;  %v220_v14 = vld [vmem:[%s1946_s29 + $0xd8] sm:$0xff] }
  0x21   : > { %v534_v49 = vsel %vm488_vm0, %v359_v45, 0.0  ;;  %v361_v51 = vmul.f32 %v1941_v0, %v210_v47  ;;  %v360_v52 = vmul.f32 %v1941_v0, %v209_v48  ;;  %v363_v57 = vmul.f32 %v1941_v0, %v212_v53  ;;  %v219_v15 = vld [vmem:[%s1946_s29 + $0xd0] sm:$0xff]  ;;  %v221_v21 = vld [vmem:[%s1946_s29 + $0xe0] sm:$0xff] }
  0x22   : > { %v531_v50 = vsel %vm488_vm0, %v358_v46, 0.0  ;;  %v362_v58 = vmul.f32 %v1941_v0, %v211_v54  ;;  %v365_v63 = vmul.f32 %v1941_v0, %v214_v59  ;;  %v364_v1 = vmul.f32 %v1941_v0, %v213_v60  ;;  %v223_v27 = vld [vmem:[%s1946_s29 + $0xf0] sm:$0xff]  ;;  %v225_v33 = vld [vmem:[%s1946_s29 + $0x100] sm:$0xff] }
  0x23   : > { %v540_v55 = vsel %vm488_vm0, %v361_v51, 0.0  ;;  %v537_v56 = vsel %vm488_vm0, %v360_v52, 0.0  ;;  %v546_v61 = vsel %vm488_vm0, %v363_v57, 0.0  ;;  %v367_v6 = vmul.f32 %v1941_v0, %v216_v2  ;;  %v227_v39 = vld [vmem:[%s1946_s29 + $0x110] sm:$0xff]  ;;  %v229_v45 = vld [vmem:[%s1946_s29 + $0x120] sm:$0xff] }
  0x24   : > { %505 = vadd.xlane.f32.xlu1 %v504_v19  ;;  %502 = vadd.xlane.f32.xlu0 %v501_v20  ;;  %v543_v62 = vsel %vm488_vm0, %v362_v58, 0.0  ;;  %v552_v4 = vsel %vm488_vm0, %v365_v63, 0.0  ;;  %v549_v5 = vsel %vm488_vm0, %v364_v1, 0.0  ;;  %v366_v7 = vmul.f32 %v1941_v0, %v215_v3  ;;  %v222_v20 = vld [vmem:[%s1946_s29 + $0xe8] sm:$0xff]  ;;  %v231_v51 = vld [vmem:[%s1946_s29 + $0x130] sm:$0xff]  ;;  %v233_v57 = vld [vmem:[%s1946_s29 + $0x140] sm:$0xff] }
  0x25   : > { %v558_v10 = vsel %vm488_vm0, %v367_v6, 0.0  ;;  %v369_v12 = vmul.f32 %v1941_v0, %v218_v8  ;;  %v368_v13 = vmul.f32 %v1941_v0, %v217_v9  ;;  %v371_v18 = vmul.f32 %v1941_v0, %v220_v14  ;;  %v235_v63 = vld [vmem:[%s1946_s29 + $0x150] sm:$0xff]  ;;  %v237_v6 = vld [vmem:[%s1946_s29 + $0x160] sm:$0xff] }
  0x26   : > { %v555_v11 = vsel %vm488_vm0, %v366_v7, 0.0  ;;  %v370_v19 = vmul.f32 %v1941_v0, %v219_v15  ;;  %v373_v24 = vmul.f32 %v1941_v0, %v222_v20 }
  0x27   : > { %v564_v16 = vsel %vm488_vm0, %v369_v12, 0.0  ;;  %v561_v17 = vsel %vm488_vm0, %v368_v13, 0.0  ;;  %v570_v22 = vsel %vm488_vm0, %v371_v18, 0.0  ;;  %v239_v12 = vld [vmem:[%s1946_s29 + $0x170] sm:$0xff]  ;;  %v241_v18 = vld [vmem:[%s1946_s29 + $0x180] sm:$0xff] }
  0x28   : > { %511 = vadd.xlane.f32.xlu1 %v510_v25  ;;  %508 = vadd.xlane.f32.xlu0 %v507_v26  ;;  %v567_v23 = vsel %vm488_vm0, %v370_v19, 0.0  ;;  %v372_v25 = vmul.f32 %v1941_v0, %v221_v21  ;;  %v224_v26 = vld [vmem:[%s1946_s29 + $0xf8] sm:$0xff]  ;;  %v576_v28 = vsel %vm488_vm0, %v373_v24, 0.0  ;;  %v243_v24 = vld [vmem:[%s1946_s29 + $0x190] sm:$0xff] }
  0x29   : > { %v375_v30 = vmul.f32 %v1941_v0, %v224_v26 }
  0x2a   : > { %v573_v29 = vsel %vm488_vm0, %v372_v25, 0.0 }
  0x2b   : > { %v582_v34 = vsel %vm488_vm0, %v375_v30, 0.0  ;;  %v245_v30 = vld [vmem:[%s1946_s29 + $0x1a0] sm:$0xff] }
  0x2c   : > { %517 = vadd.xlane.f32.xlu1 %v516_v31  ;;  %514 = vadd.xlane.f32.xlu0 %v513_v32  ;;  %v374_v31 = vmul.f32 %v1941_v0, %v223_v27  ;;  %v226_v32 = vld [vmem:[%s1946_s29 + $0x108] sm:$0xff] }
  0x2d   : > { %v377_v36 = vmul.f32 %v1941_v0, %v226_v32 }
  0x2e   : > { %v579_v35 = vsel %vm488_vm0, %v374_v31, 0.0 }
  0x2f   : > { %v588_v40 = vsel %vm488_vm0, %v377_v36, 0.0  ;;  %v247_v36 = vld [vmem:[%s1946_s29 + $0x1b0] sm:$0xff] }
  0x30   : > { %523 = vadd.xlane.f32.xlu1 %v522_v37  ;;  %520 = vadd.xlane.f32.xlu0 %v519_v38  ;;  %v376_v37 = vmul.f32 %v1941_v0, %v225_v33  ;;  %v228_v38 = vld [vmem:[%s1946_s29 + $0x118] sm:$0xff] }
  0x31   : > { %v379_v42 = vmul.f32 %v1941_v0, %v228_v38 }
  0x32   : > { %v585_v41 = vsel %vm488_vm0, %v376_v37, 0.0 }
  0x33   : > { %v594_v46 = vsel %vm488_vm0, %v379_v42, 0.0  ;;  %v249_v42 = vld [vmem:[%s1946_s29 + $0x1c0] sm:$0xff] }
  0x34   : > { %529 = vadd.xlane.f32.xlu1 %v528_v43  ;;  %526 = vadd.xlane.f32.xlu0 %v525_v44  ;;  %v378_v43 = vmul.f32 %v1941_v0, %v227_v39  ;;  %v230_v44 = vld [vmem:[%s1946_s29 + $0x128] sm:$0xff] }
  0x35   : > { %v381_v48 = vmul.f32 %v1941_v0, %v230_v44 }
  0x36   : > { %v591_v47 = vsel %vm488_vm0, %v378_v43, 0.0 }
  0x37   : > { %v600_v52 = vsel %vm488_vm0, %v381_v48, 0.0  ;;  %v251_v48 = vld [vmem:[%s1946_s29 + $0x1d0] sm:$0xff] }
  0x38   : > { %535 = vadd.xlane.f32.xlu1 %v534_v49  ;;  %532 = vadd.xlane.f32.xlu0 %v531_v50  ;;  %v380_v49 = vmul.f32 %v1941_v0, %v229_v45  ;;  %v232_v50 = vld [vmem:[%s1946_s29 + $0x138] sm:$0xff] }
  0x39   : > { %v383_v54 = vmul.f32 %v1941_v0, %v232_v50 }
  0x3a   : > { %v597_v53 = vsel %vm488_vm0, %v380_v49, 0.0 }
  0x3b   : > { %v606_v58 = vsel %vm488_vm0, %v383_v54, 0.0  ;;  %v253_v54 = vld [vmem:[%s1946_s29 + $0x1e0] sm:$0xff] }
  0x3c   : > { %541 = vadd.xlane.f32.xlu1 %v540_v55  ;;  %538 = vadd.xlane.f32.xlu0 %v537_v56  ;;  %v382_v55 = vmul.f32 %v1941_v0, %v231_v51  ;;  %v234_v56 = vld [vmem:[%s1946_s29 + $0x148] sm:$0xff] }
  0x3d   : > { %v385_v60 = vmul.f32 %v1941_v0, %v234_v56 }
  0x3e   : > { %v603_v59 = vsel %vm488_vm0, %v382_v55, 0.0 }
  0x3f   : > { %v612_v1 = vsel %vm488_vm0, %v385_v60, 0.0  ;;  %v255_v60 = vld [vmem:[%s1946_s29 + $0x1f0] sm:$0xff] }
  0x40   : > { %547 = vadd.xlane.f32.xlu1 %v546_v61  ;;  %544 = vadd.xlane.f32.xlu0 %v543_v62  ;;  %v384_v61 = vmul.f32 %v1941_v0, %v233_v57  ;;  %v236_v62 = vld [vmem:[%s1946_s29 + $0x158] sm:$0xff] }
  0x41   : > { %v387_v3 = vmul.f32 %v1941_v0, %v236_v62 }
  0x42   : > { %v609_v2 = vsel %vm488_vm0, %v384_v61, 0.0 }
  0x43   : > { %v618_v7 = vsel %vm488_vm0, %v387_v3, 0.0  ;;  %v257_v3 = vld [vmem:[%s1946_s29 + $0x200] sm:$0xff] }
  0x44   : > { %553 = vadd.xlane.f32.xlu1 %v552_v4  ;;  %550 = vadd.xlane.f32.xlu0 %v549_v5  ;;  %v386_v4 = vmul.f32 %v1941_v0, %v235_v63  ;;  %v238_v5 = vld [vmem:[%s1946_s29 + $0x168] sm:$0xff] }
  0x45   : > { %v389_v9 = vmul.f32 %v1941_v0, %v238_v5 }
  0x46   : > { %v615_v8 = vsel %vm488_vm0, %v386_v4, 0.0 }
  0x47   : > { %v624_v13 = vsel %vm488_vm0, %v389_v9, 0.0  ;;  %v259_v9 = vld [vmem:[%s1946_s29 + $0x210] sm:$0xff] }
  0x48   : > { %559 = vadd.xlane.f32.xlu1 %v558_v10  ;;  %556 = vadd.xlane.f32.xlu0 %v555_v11  ;;  %v388_v10 = vmul.f32 %v1941_v0, %v237_v6  ;;  %v240_v11 = vld [vmem:[%s1946_s29 + $0x178] sm:$0xff] }
  0x49   : > { %v391_v15 = vmul.f32 %v1941_v0, %v240_v11 }
  0x4a   : > { %v621_v14 = vsel %vm488_vm0, %v388_v10, 0.0 }
  0x4b   : > { %v630_v19 = vsel %vm488_vm0, %v391_v15, 0.0  ;;  %v261_v15 = vld [vmem:[%s1946_s29 + $0x220] sm:$0xff] }
  0x4c   : > { %565 = vadd.xlane.f32.xlu1 %v564_v16  ;;  %562 = vadd.xlane.f32.xlu0 %v561_v17  ;;  %v390_v16 = vmul.f32 %v1941_v0, %v239_v12  ;;  %v242_v17 = vld [vmem:[%s1946_s29 + $0x188] sm:$0xff] }
  0x4d   : > { %v393_v21 = vmul.f32 %v1941_v0, %v242_v17 }
  0x4e   : > { %v627_v20 = vsel %vm488_vm0, %v390_v16, 0.0 }
  0x4f   : > { %v636_v25 = vsel %vm488_vm0, %v393_v21, 0.0  ;;  %v263_v21 = vld [vmem:[%s1946_s29 + $0x230] sm:$0xff] }
  0x50   : > { %571 = vadd.xlane.f32.xlu1 %v570_v22  ;;  %568 = vadd.xlane.f32.xlu0 %v567_v23  ;;  %v392_v22 = vmul.f32 %v1941_v0, %v241_v18  ;;  %v244_v23 = vld [vmem:[%s1946_s29 + $0x198] sm:$0xff] }
  0x51   : > { %v395_v27 = vmul.f32 %v1941_v0, %v244_v23 }
  0x52   : > { %v633_v26 = vsel %vm488_vm0, %v392_v22, 0.0 }
  0x53   : > { %v642_v31 = vsel %vm488_vm0, %v395_v27, 0.0  ;;  %v265_v27 = vld [vmem:[%s1946_s29 + $0x240] sm:$0xff] }
  0x54   : > { %577 = vadd.xlane.f32.xlu1 %v576_v28  ;;  %574 = vadd.xlane.f32.xlu0 %v573_v29  ;;  %v394_v28 = vmul.f32 %v1941_v0, %v243_v24  ;;  %v246_v29 = vld [vmem:[%s1946_s29 + $0x1a8] sm:$0xff] }
  0x55   : > { %v397_v33 = vmul.f32 %v1941_v0, %v246_v29 }
  0x56   : > { %v639_v32 = vsel %vm488_vm0, %v394_v28, 0.0 }
  0x57   : > { %v648_v37 = vsel %vm488_vm0, %v397_v33, 0.0  ;;  %v267_v33 = vld [vmem:[%s1946_s29 + $0x250] sm:$0xff] }
  0x58   : > { %583 = vadd.xlane.f32.xlu1 %v582_v34  ;;  %580 = vadd.xlane.f32.xlu0 %v579_v35  ;;  %v396_v34 = vmul.f32 %v1941_v0, %v245_v30  ;;  %v248_v35 = vld [vmem:[%s1946_s29 + $0x1b8] sm:$0xff] }
  0x59   : > { %v399_v39 = vmul.f32 %v1941_v0, %v248_v35 }
  0x5a   : > { %v645_v38 = vsel %vm488_vm0, %v396_v34, 0.0  ;;  %v2171_v34 = vstv %s921_s30 }
  0x5b   : > { %v654_v43 = vsel %vm488_vm0, %v399_v39, 0.0 }
  0x5c   : > { %589 = vadd.xlane.f32.xlu1 %v588_v40  ;;  %586 = vadd.xlane.f32.xlu0 %v585_v41  ;;  %v398_v40 = vmul.f32 %v1941_v0, %v247_v36  ;;  %v250_v41 = vld [vmem:[%s1946_s29 + $0x1c8] sm:$0xff] }
  0x5d   : > { %v401_v45 = vmul.f32 %v1941_v0, %v250_v41 }
  0x5e   : > { %v651_v44 = vsel %vm488_vm0, %v398_v40, 0.0  ;;  %v418_v40 = vmul.f32 %v1941_v0, %v267_v33 }
  0x5f   : > { %v660_v49 = vsel %vm488_vm0, %v401_v45, 0.0 }
  0x60   : > { %595 = vadd.xlane.f32.xlu1 %v594_v46  ;;  %592 = vadd.xlane.f32.xlu0 %v591_v47  ;;  %v400_v46 = vmul.f32 %v1941_v0, %v249_v42  ;;  %v252_v47 = vld [vmem:[%s1946_s29 + $0x1d8] sm:$0xff] }
  0x61   : > { %v403_v51 = vmul.f32 %v1941_v0, %v252_v47 }
  0x62   : > { %v657_v50 = vsel %vm488_vm0, %v400_v46, 0.0 }
  0x63   : > { %v666_v55 = vsel %vm488_vm0, %v403_v51, 0.0 }
  0x64   : > { %601 = vadd.xlane.f32.xlu1 %v600_v52  ;;  %598 = vadd.xlane.f32.xlu0 %v597_v53  ;;  %v402_v52 = vmul.f32 %v1941_v0, %v251_v48  ;;  %v254_v53 = vld [vmem:[%s1946_s29 + $0x1e8] sm:$0xff]  ;;  %v711_v48 = vsel %vm488_vm0, %v418_v40, 0.0 }
  0x65   : > { %v405_v57 = vmul.f32 %v1941_v0, %v254_v53  ;;  %v272_v53 = vld [vmem:[%s1946_s29 + $0x278] sm:$0xff] }
  0x66   : > { %v663_v56 = vsel %vm488_vm0, %v402_v52, 0.0 }
  0x67   : > { %v672_v61 = vsel %vm488_vm0, %v405_v57, 0.0 }
  0x68   : > { %607 = vadd.xlane.f32.xlu1 %v606_v58  ;;  %604 = vadd.xlane.f32.xlu0 %v603_v59  ;;  %v404_v58 = vmul.f32 %v1941_v0, %v253_v54  ;;  %v256_v59 = vld [vmem:[%s1946_s29 + $0x1f8] sm:$0xff]  ;;  %v271_v54 = vld [vmem:[%s1946_s29 + $0x270] sm:$0xff] }
  0x69   : > { %v407_v63 = vmul.f32 %v1941_v0, %v256_v59  ;;  %v423_v59 = vmul.f32 %v1941_v0, %v272_v53 }
  0x6a   : > { %v669_v62 = vsel %vm488_vm0, %v404_v58, 0.0 }
  0x6b   : > { %v678_v4 = vsel %vm488_vm0, %v407_v63, 0.0  ;;  %v274_v63 = vld [vmem:[%s1946_s29 + $0x288] sm:$0xff] }
  0x6c   : > { %613 = vadd.xlane.f32.xlu1 %v612_v1  ;;  %610 = vadd.xlane.f32.xlu0 %v609_v2  ;;  %v406_v1 = vmul.f32 %v1941_v0, %v255_v60  ;;  %v258_v2 = vld [vmem:[%s1946_s29 + $0x208] sm:$0xff]  ;;  %v422_v60 = vmul.f32 %v1941_v0, %v271_v54 }
  0x6d   : > { %v409_v6 = vmul.f32 %v1941_v0, %v258_v2 }
  0x6e   : > { %v675_v5 = vsel %vm488_vm0, %v406_v1, 0.0  ;;  %v273_v1 = vld [vmem:[%s1946_s29 + $0x280] sm:$0xff] }
  0x6f   : > { %v684_v10 = vsel %vm488_vm0, %v409_v6, 0.0  ;;  %v425_v6 = vmul.f32 %v1941_v0, %v274_v63 }
  0x70   : > { %619 = vadd.xlane.f32.xlu1 %v618_v7  ;;  %616 = vadd.xlane.f32.xlu0 %v615_v8  ;;  %v408_v7 = vmul.f32 %v1941_v0, %v257_v3  ;;  %v260_v8 = vld [vmem:[%s1946_s29 + $0x218] sm:$0xff] }
  0x71   : > { %v411_v12 = vmul.f32 %v1941_v0, %v260_v8 }
  0x72   : > { %v681_v11 = vsel %vm488_vm0, %v408_v7, 0.0  ;;  %v424_v7 = vmul.f32 %v1941_v0, %v273_v1 }
  0x73   : > { %v690_v16 = vsel %vm488_vm0, %v411_v12, 0.0 }
  0x74   : > { %625 = vadd.xlane.f32.xlu1 %v624_v13  ;;  %622 = vadd.xlane.f32.xlu0 %v621_v14  ;;  %v410_v13 = vmul.f32 %v1941_v0, %v259_v9  ;;  %v262_v14 = vld [vmem:[%s1946_s29 + $0x228] sm:$0xff] }
  0x75   : > { %v413_v18 = vmul.f32 %v1941_v0, %v262_v14  ;;  %v732_v14 = vsel %vm488_vm0, %v425_v6, 0.0 }
  0x76   : > { %v687_v17 = vsel %vm488_vm0, %v410_v13, 0.0 }
  0x77   : > { %v696_v22 = vsel %vm488_vm0, %v413_v18, 0.0 }
  0x78   : > { %631 = vadd.xlane.f32.xlu1 %v630_v19  ;;  %628 = vadd.xlane.f32.xlu0 %v627_v20  ;;  %v412_v19 = vmul.f32 %v1941_v0, %v261_v15  ;;  %v264_v20 = vld [vmem:[%s1946_s29 + $0x238] sm:$0xff]  ;;  %v729_v15 = vsel %vm488_vm0, %v424_v7, 0.0 }
  0x79   : > { %v415_v24 = vmul.f32 %v1941_v0, %v264_v20  ;;  %v278_v20 = vld [vmem:[%s1946_s29 + $0x2a8] sm:$0xff] }
  0x7a   : > { %v693_v23 = vsel %vm488_vm0, %v412_v19, 0.0 }
  0x7b   : > { %v702_v28 = vsel %vm488_vm0, %v415_v24, 0.0 }
  0x7c   : > { %637 = vadd.xlane.f32.xlu1 %v636_v25  ;;  %634 = vadd.xlane.f32.xlu0 %v633_v26  ;;  %v414_v25 = vmul.f32 %v1941_v0, %v263_v21  ;;  %v266_v26 = vld [vmem:[%s1946_s29 + $0x248] sm:$0xff]  ;;  %v277_v21 = vld [vmem:[%s1946_s29 + $0x2a0] sm:$0xff] }
  0x7d   : > { %v417_v30 = vmul.f32 %v1941_v0, %v266_v26  ;;  %v429_v26 = vmul.f32 %v1941_v0, %v278_v20 }
  0x7e   : > { %v699_v29 = vsel %vm488_vm0, %v414_v25, 0.0 }
  0x80   : > { %643 = vadd.xlane.f32.xlu1 %v642_v31  ;;  %640 = vadd.xlane.f32.xlu0 %v639_v32  ;;  %v416_v31 = vmul.f32 %v1941_v0, %v265_v27  ;;  %v268_v32 = vld [vmem:[%s1946_s29 + $0x258] sm:$0xff]  ;;  %v428_v27 = vmul.f32 %v1941_v0, %v277_v21 }
  0x81   : > { %v419_v39 = vmul.f32 %v1941_v0, %v268_v32 }
  0x83   : > { %v714_v47 = vsel %vm488_vm0, %v419_v39, 0.0 }
  0x84   : > { %649 = vadd.xlane.f32.xlu1 %v648_v37  ;;  %646 = vadd.xlane.f32.xlu0 %v645_v38  ;;  %v708_v37 = vsel %vm488_vm0, %v417_v30, 0.0  ;;  %v705_v38 = vsel %vm488_vm0, %v416_v31, 0.0  ;;  %v280_v30 = vld [vmem:[%s1946_s29 + $0x2b8] sm:$0xff]  ;;  %v279_v31 = vld [vmem:[%s1946_s29 + $0x2b0] sm:$0xff] }
  0x88   : > { %655 = vadd.xlane.f32.xlu1 %v654_v43  ;;  %652 = vadd.xlane.f32.xlu0 %v651_v44  ;;  %v270_v43 = vld [vmem:[%s1946_s29 + $0x268] sm:$0xff]  ;;  %v269_v44 = vld [vmem:[%s1946_s29 + $0x260] sm:$0xff] }
  0x8c   : > { %661 = vadd.xlane.f32.xlu1 %v660_v49  ;;  %658 = vadd.xlane.f32.xlu0 %v657_v50  ;;  %v421_v49 = vmul.f32 %v1941_v0, %v270_v43  ;;  %v420_v50 = vmul.f32 %v1941_v0, %v269_v44 }
  0x8e   : > { %v720_v57 = vsel %vm488_vm0, %v421_v49, 0.0  ;;  %v717_v58 = vsel %vm488_vm0, %v420_v50, 0.0 }
  0x90   : > { %667 = vadd.xlane.f32.xlu1 %v666_v55  ;;  %664 = vadd.xlane.f32.xlu0 %v663_v56 }
  0x94   : > { %673 = vadd.xlane.f32.xlu1 %v672_v61  ;;  %670 = vadd.xlane.f32.xlu0 %v669_v62 }
  0x98   : > { %679 = vadd.xlane.f32.xlu1 %v678_v4  ;;  %676 = vadd.xlane.f32.xlu0 %v675_v5  ;;  %v726_v4 = vsel %vm488_vm0, %v423_v59, 0.0  ;;  %v723_v5 = vsel %vm488_vm0, %v422_v60, 0.0 }
  0x9c   : > { %685 = vadd.xlane.f32.xlu1 %v684_v10  ;;  %682 = vadd.xlane.f32.xlu0 %v681_v11  ;;  %v276_v10 = vld [vmem:[%s1946_s29 + $0x298] sm:$0xff]  ;;  %v275_v11 = vld [vmem:[%s1946_s29 + $0x290] sm:$0xff] }
  0xa0   : > { %691 = vadd.xlane.f32.xlu1 %v690_v16  ;;  %688 = vadd.xlane.f32.xlu0 %v687_v17  ;;  %v427_v16 = vmul.f32 %v1941_v0, %v276_v10  ;;  %v426_v17 = vmul.f32 %v1941_v0, %v275_v11 }
  0xa2   : > { %v738_v24 = vsel %vm488_vm0, %v427_v16, 0.0  ;;  %v735_v25 = vsel %vm488_vm0, %v426_v17, 0.0 }
  0xa4   : > { %697 = vadd.xlane.f32.xlu1 %v696_v22  ;;  %694 = vadd.xlane.f32.xlu0 %v693_v23 }
  0xa8   : > { %703 = vadd.xlane.f32.xlu1 %v702_v28  ;;  %700 = vadd.xlane.f32.xlu0 %v699_v29 }
  0xa9   : > { %v497_v35 = vpop.xlane.xlu1 %496  ;;  %v491_v36 = vpop.xlane.xlu0 %490 }
  0xaa   : > { %v925_v41 = vadd.f32 %v2171_v34, %v497_v35  ;;  %v923_v42 = vadd.f32 %v2171_v34, %v491_v36  ;;  %v744_v35 = vsel %vm488_vm0, %v429_v26, 0.0  ;;  %v741_v36 = vsel %vm488_vm0, %v428_v27, 0.0 }
  0xac   : > { %1070 = vst.msk [vmem:[%s2181_s6 + $0x10] sm:$0xff] %vm1067_vm1, %v925_v41  ;;  %1068 = vst.msk [vmem:[%s2181_s6] sm:$0xff] %vm1067_vm1, %v923_v42  ;;  %709 = vadd.xlane.f32.xlu1 %v708_v37  ;;  %706 = vadd.xlane.f32.xlu0 %v705_v38  ;;  %v431_v37 = vmul.f32 %v1941_v0, %v280_v30  ;;  %v430_v38 = vmul.f32 %v1941_v0, %v279_v31  ;;  %v282_v41 = vld [vmem:[%s1946_s29 + $0x2c8] sm:$0xff]  ;;  %v281_v42 = vld [vmem:[%s1946_s29 + $0x2c0] sm:$0xff] }
  0xad   : > { %v500_v45 = vpop.xlane.xlu1 %499  ;;  %v494_v46 = vpop.xlane.xlu0 %493 }
  0xae   : > { %v926_v51 = vadd.f32 %v2171_v34, %v500_v45  ;;  %v924_v52 = vadd.f32 %v2171_v34, %v494_v46  ;;  %v750_v45 = vsel %vm488_vm0, %v431_v37, 0.0  ;;  %v747_v46 = vsel %vm488_vm0, %v430_v38, 0.0 }
  0xb0   : > { %1071 = vst.msk [vmem:[%s2181_s6 + $0x18] sm:$0xff] %vm1067_vm1, %v926_v51  ;;  %1069 = vst.msk [vmem:[%s2181_s6 + $0x8] sm:$0xff] %vm1067_vm1, %v924_v52  ;;  %715 = vadd.xlane.f32.xlu1 %v714_v47  ;;  %712 = vadd.xlane.f32.xlu0 %v711_v48  ;;  %v433_v47 = vmul.f32 %v1941_v0, %v282_v41  ;;  %v432_v48 = vmul.f32 %v1941_v0, %v281_v42  ;;  %v284_v51 = vld [vmem:[%s1946_s29 + $0x2d8] sm:$0xff]  ;;  %v283_v52 = vld [vmem:[%s1946_s29 + $0x2d0] sm:$0xff] }
  0xb1   : > { %v506_v55 = vpop.xlane.xlu1 %505  ;;  %v503_v56 = vpop.xlane.xlu0 %502 }
  0xb2   : > { %v928_v61 = vadd.f32 %v2171_v34, %v506_v55  ;;  %v927_v62 = vadd.f32 %v2171_v34, %v503_v56  ;;  %v756_v55 = vsel %vm488_vm0, %v433_v47, 0.0  ;;  %v753_v56 = vsel %vm488_vm0, %v432_v48, 0.0 }
  0xb4   : > { %1073 = vst.msk [vmem:[%s2181_s6 + $0x28] sm:$0xff] %vm1067_vm1, %v928_v61  ;;  %1072 = vst.msk [vmem:[%s2181_s6 + $0x20] sm:$0xff] %vm1067_vm1, %v927_v62  ;;  %721 = vadd.xlane.f32.xlu1 %v720_v57  ;;  %718 = vadd.xlane.f32.xlu0 %v717_v58  ;;  %v435_v57 = vmul.f32 %v1941_v0, %v284_v51  ;;  %v434_v58 = vmul.f32 %v1941_v0, %v283_v52  ;;  %v286_v61 = vld [vmem:[%s1946_s29 + $0x2e8] sm:$0xff]  ;;  %v285_v62 = vld [vmem:[%s1946_s29 + $0x2e0] sm:$0xff] }
  0xb5   : > { %v512_v2 = vpop.xlane.xlu1 %511  ;;  %v509_v3 = vpop.xlane.xlu0 %508 }
  0xb6   : > { %v930_v8 = vadd.f32 %v2171_v34, %v512_v2  ;;  %v929_v9 = vadd.f32 %v2171_v34, %v509_v3  ;;  %v762_v2 = vsel %vm488_vm0, %v435_v57, 0.0  ;;  %v759_v3 = vsel %vm488_vm0, %v434_v58, 0.0 }
  0xb8   : > { %1075 = vst.msk [vmem:[%s2181_s6 + $0x38] sm:$0xff] %vm1067_vm1, %v930_v8  ;;  %1074 = vst.msk [vmem:[%s2181_s6 + $0x30] sm:$0xff] %vm1067_vm1, %v929_v9  ;;  %727 = vadd.xlane.f32.xlu1 %v726_v4  ;;  %724 = vadd.xlane.f32.xlu0 %v723_v5  ;;  %v437_v4 = vmul.f32 %v1941_v0, %v286_v61  ;;  %v436_v5 = vmul.f32 %v1941_v0, %v285_v62  ;;  %v288_v8 = vld [vmem:[%s1946_s29 + $0x2f8] sm:$0xff]  ;;  %v287_v9 = vld [vmem:[%s1946_s29 + $0x2f0] sm:$0xff] }
  0xb9   : > { %v518_v12 = vpop.xlane.xlu1 %517  ;;  %v515_v13 = vpop.xlane.xlu0 %514 }
  0xba   : > { %v932_v18 = vadd.f32 %v2171_v34, %v518_v12  ;;  %v931_v19 = vadd.f32 %v2171_v34, %v515_v13  ;;  %v768_v12 = vsel %vm488_vm0, %v437_v4, 0.0  ;;  %v765_v13 = vsel %vm488_vm0, %v436_v5, 0.0 }
  0xbc   : > { %1077 = vst.msk [vmem:[%s2181_s6 + $0x48] sm:$0xff] %vm1067_vm1, %v932_v18  ;;  %1076 = vst.msk [vmem:[%s2181_s6 + $0x40] sm:$0xff] %vm1067_vm1, %v931_v19  ;;  %733 = vadd.xlane.f32.xlu1 %v732_v14  ;;  %730 = vadd.xlane.f32.xlu0 %v729_v15  ;;  %v439_v14 = vmul.f32 %v1941_v0, %v288_v8  ;;  %v438_v15 = vmul.f32 %v1941_v0, %v287_v9  ;;  %v290_v18 = vld [vmem:[%s1946_s29 + $0x308] sm:$0xff]  ;;  %v289_v19 = vld [vmem:[%s1946_s29 + $0x300] sm:$0xff] }
  0xbd   : > { %v524_v22 = vpop.xlane.xlu1 %523  ;;  %v521_v23 = vpop.xlane.xlu0 %520 }
  0xbe   : > { %v934_v28 = vadd.f32 %v2171_v34, %v524_v22  ;;  %v933_v29 = vadd.f32 %v2171_v34, %v521_v23  ;;  %v774_v22 = vsel %vm488_vm0, %v439_v14, 0.0  ;;  %v771_v23 = vsel %vm488_vm0, %v438_v15, 0.0 }
  0xc0   : > { %1079 = vst.msk [vmem:[%s2181_s6 + $0x58] sm:$0xff] %vm1067_vm1, %v934_v28  ;;  %1078 = vst.msk [vmem:[%s2181_s6 + $0x50] sm:$0xff] %vm1067_vm1, %v933_v29  ;;  %739 = vadd.xlane.f32.xlu1 %v738_v24  ;;  %736 = vadd.xlane.f32.xlu0 %v735_v25  ;;  %v441_v24 = vmul.f32 %v1941_v0, %v290_v18  ;;  %v440_v25 = vmul.f32 %v1941_v0, %v289_v19  ;;  %v292_v28 = vld [vmem:[%s1946_s29 + $0x318] sm:$0xff]  ;;  %v291_v29 = vld [vmem:[%s1946_s29 + $0x310] sm:$0xff] }
  0xc1   : > { %v530_v32 = vpop.xlane.xlu1 %529  ;;  %v527_v33 = vpop.xlane.xlu0 %526 }
  0xc2   : > { %v936_v39 = vadd.f32 %v2171_v34, %v530_v32  ;;  %v935_v40 = vadd.f32 %v2171_v34, %v527_v33  ;;  %v780_v32 = vsel %vm488_vm0, %v441_v24, 0.0  ;;  %v777_v33 = vsel %vm488_vm0, %v440_v25, 0.0 }
  0xc4   : > { %1081 = vst.msk [vmem:[%s2181_s6 + $0x68] sm:$0xff] %vm1067_vm1, %v936_v39  ;;  %1080 = vst.msk [vmem:[%s2181_s6 + $0x60] sm:$0xff] %vm1067_vm1, %v935_v40  ;;  %745 = vadd.xlane.f32.xlu1 %v744_v35  ;;  %742 = vadd.xlane.f32.xlu0 %v741_v36  ;;  %v443_v35 = vmul.f32 %v1941_v0, %v292_v28  ;;  %v442_v36 = vmul.f32 %v1941_v0, %v291_v29  ;;  %v294_v39 = vld [vmem:[%s1946_s29 + $0x328] sm:$0xff]  ;;  %v293_v40 = vld [vmem:[%s1946_s29 + $0x320] sm:$0xff] }
  0xc5   : > { %v536_v43 = vpop.xlane.xlu1 %535  ;;  %v533_v44 = vpop.xlane.xlu0 %532 }
  0xc6   : > { %v938_v49 = vadd.f32 %v2171_v34, %v536_v43  ;;  %v937_v50 = vadd.f32 %v2171_v34, %v533_v44  ;;  %v786_v43 = vsel %vm488_vm0, %v443_v35, 0.0  ;;  %v783_v44 = vsel %vm488_vm0, %v442_v36, 0.0 }
  0xc8   : > { %1083 = vst.msk [vmem:[%s2181_s6 + $0x78] sm:$0xff] %vm1067_vm1, %v938_v49  ;;  %1082 = vst.msk [vmem:[%s2181_s6 + $0x70] sm:$0xff] %vm1067_vm1, %v937_v50  ;;  %751 = vadd.xlane.f32.xlu1 %v750_v45  ;;  %748 = vadd.xlane.f32.xlu0 %v747_v46  ;;  %v445_v45 = vmul.f32 %v1941_v0, %v294_v39  ;;  %v444_v46 = vmul.f32 %v1941_v0, %v293_v40  ;;  %v296_v49 = vld [vmem:[%s1946_s29 + $0x338] sm:$0xff]  ;;  %v295_v50 = vld [vmem:[%s1946_s29 + $0x330] sm:$0xff] }
  0xc9   : > { %v542_v53 = vpop.xlane.xlu1 %541  ;;  %v539_v54 = vpop.xlane.xlu0 %538 }
  0xca   : > { %v940_v59 = vadd.f32 %v2171_v34, %v542_v53  ;;  %v939_v60 = vadd.f32 %v2171_v34, %v539_v54  ;;  %v792_v53 = vsel %vm488_vm0, %v445_v45, 0.0  ;;  %v789_v54 = vsel %vm488_vm0, %v444_v46, 0.0 }
  0xcc   : > { %1085 = vst.msk [vmem:[%s2181_s6 + $0x88] sm:$0xff] %vm1067_vm1, %v940_v59  ;;  %1084 = vst.msk [vmem:[%s2181_s6 + $0x80] sm:$0xff] %vm1067_vm1, %v939_v60  ;;  %757 = vadd.xlane.f32.xlu1 %v756_v55  ;;  %754 = vadd.xlane.f32.xlu0 %v753_v56  ;;  %v447_v55 = vmul.f32 %v1941_v0, %v296_v49  ;;  %v446_v56 = vmul.f32 %v1941_v0, %v295_v50  ;;  %v298_v59 = vld [vmem:[%s1946_s29 + $0x348] sm:$0xff]  ;;  %v297_v60 = vld [vmem:[%s1946_s29 + $0x340] sm:$0xff] }
  0xcd   : > { %v548_v63 = vpop.xlane.xlu1 %547  ;;  %v545_v1 = vpop.xlane.xlu0 %544 }
  0xce   : > { %v942_v6 = vadd.f32 %v2171_v34, %v548_v63  ;;  %v941_v7 = vadd.f32 %v2171_v34, %v545_v1  ;;  %v798_v0 = vsel %vm488_vm0, %v447_v55, 0.0  ;;  %v795_v63 = vsel %vm488_vm0, %v446_v56, 0.0  ;;  %v2360_v1 = vld [vmem:[%s3029_s1] ss:$0 sm:$0xff] }
  0xd0   : > { %1087 = vst.msk [vmem:[%s2181_s6 + $0x98] sm:$0xff] %vm1067_vm1, %v942_v6  ;;  %1086 = vst.msk [vmem:[%s2181_s6 + $0x90] sm:$0xff] %vm1067_vm1, %v941_v7  ;;  %763 = vadd.xlane.f32.xlu1 %v762_v2  ;;  %760 = vadd.xlane.f32.xlu0 %v759_v3  ;;  %v449_v2 = vmul.f32 %v2360_v1, %v298_v59  ;;  %v448_v3 = vmul.f32 %v2360_v1, %v297_v60  ;;  %v300_v6 = vld [vmem:[%s1946_s29 + $0x358] sm:$0xff]  ;;  %v299_v7 = vld [vmem:[%s1946_s29 + $0x350] sm:$0xff] }
  0xd1   : > { %v554_v10 = vpop.xlane.xlu1 %553  ;;  %v551_v11 = vpop.xlane.xlu0 %550 }
  0xd2   : > { %v944_v16 = vadd.f32 %v2171_v34, %v554_v10  ;;  %v943_v17 = vadd.f32 %v2171_v34, %v551_v11  ;;  %v804_v10 = vsel %vm488_vm0, %v449_v2, 0.0  ;;  %v801_v11 = vsel %vm488_vm0, %v448_v3, 0.0 }
  0xd4   : > { %1089 = vst.msk [vmem:[%s2181_s6 + $0xa8] sm:$0xff] %vm1067_vm1, %v944_v16  ;;  %1088 = vst.msk [vmem:[%s2181_s6 + $0xa0] sm:$0xff] %vm1067_vm1, %v943_v17  ;;  %769 = vadd.xlane.f32.xlu1 %v768_v12  ;;  %766 = vadd.xlane.f32.xlu0 %v765_v13  ;;  %v451_v12 = vmul.f32 %v2360_v1, %v300_v6  ;;  %v450_v13 = vmul.f32 %v2360_v1, %v299_v7  ;;  %v302_v16 = vld [vmem:[%s1946_s29 + $0x368] sm:$0xff]  ;;  %v301_v17 = vld [vmem:[%s1946_s29 + $0x360] sm:$0xff] }
  0xd5   : > { %v560_v20 = vpop.xlane.xlu1 %559  ;;  %v557_v21 = vpop.xlane.xlu0 %556 }
  0xd6   : > { %v946_v26 = vadd.f32 %v2171_v34, %v560_v20  ;;  %v945_v27 = vadd.f32 %v2171_v34, %v557_v21  ;;  %v810_v20 = vsel %vm488_vm0, %v451_v12, 0.0  ;;  %v807_v21 = vsel %vm488_vm0, %v450_v13, 0.0 }
  0xd8   : > { %1091 = vst.msk [vmem:[%s2181_s6 + $0xb8] sm:$0xff] %vm1067_vm1, %v946_v26  ;;  %1090 = vst.msk [vmem:[%s2181_s6 + $0xb0] sm:$0xff] %vm1067_vm1, %v945_v27  ;;  %775 = vadd.xlane.f32.xlu1 %v774_v22  ;;  %772 = vadd.xlane.f32.xlu0 %v771_v23  ;;  %v453_v22 = vmul.f32 %v2360_v1, %v302_v16  ;;  %v452_v23 = vmul.f32 %v2360_v1, %v301_v17  ;;  %v304_v26 = vld [vmem:[%s1946_s29 + $0x378] sm:$0xff]  ;;  %v303_v27 = vld [vmem:[%s1946_s29 + $0x370] sm:$0xff] }
  0xd9   : > { %v566_v30 = vpop.xlane.xlu1 %565  ;;  %v563_v31 = vpop.xlane.xlu0 %562 }
  0xda   : > { %v948_v37 = vadd.f32 %v2171_v34, %v566_v30  ;;  %v947_v38 = vadd.f32 %v2171_v34, %v563_v31  ;;  %v816_v30 = vsel %vm488_vm0, %v453_v22, 0.0  ;;  %v813_v31 = vsel %vm488_vm0, %v452_v23, 0.0 }
  0xdc   : > { %1093 = vst.msk [vmem:[%s2181_s6 + $0xc8] sm:$0xff] %vm1067_vm1, %v948_v37  ;;  %1092 = vst.msk [vmem:[%s2181_s6 + $0xc0] sm:$0xff] %vm1067_vm1, %v947_v38  ;;  %781 = vadd.xlane.f32.xlu1 %v780_v32  ;;  %778 = vadd.xlane.f32.xlu0 %v777_v33  ;;  %v455_v32 = vmul.f32 %v2360_v1, %v304_v26  ;;  %v454_v33 = vmul.f32 %v2360_v1, %v303_v27  ;;  %v306_v37 = vld [vmem:[%s1946_s29 + $0x388] sm:$0xff]  ;;  %v305_v38 = vld [vmem:[%s1946_s29 + $0x380] sm:$0xff] }
  0xdd   : > { %v572_v41 = vpop.xlane.xlu1 %571  ;;  %v569_v42 = vpop.xlane.xlu0 %568 }
  0xde   : > { %v950_v47 = vadd.f32 %v2171_v34, %v572_v41  ;;  %v949_v48 = vadd.f32 %v2171_v34, %v569_v42  ;;  %v822_v41 = vsel %vm488_vm0, %v455_v32, 0.0  ;;  %v819_v42 = vsel %vm488_vm0, %v454_v33, 0.0 }
  0xe0   : > { %1095 = vst.msk [vmem:[%s2181_s6 + $0xd8] sm:$0xff] %vm1067_vm1, %v950_v47  ;;  %1094 = vst.msk [vmem:[%s2181_s6 + $0xd0] sm:$0xff] %vm1067_vm1, %v949_v48  ;;  %787 = vadd.xlane.f32.xlu1 %v786_v43  ;;  %784 = vadd.xlane.f32.xlu0 %v783_v44  ;;  %v457_v43 = vmul.f32 %v2360_v1, %v306_v37  ;;  %v456_v44 = vmul.f32 %v2360_v1, %v305_v38  ;;  %v308_v47 = vld [vmem:[%s1946_s29 + $0x398] sm:$0xff]  ;;  %v307_v48 = vld [vmem:[%s1946_s29 + $0x390] sm:$0xff] }
  0xe1   : > { %v578_v51 = vpop.xlane.xlu1 %577  ;;  %v575_v52 = vpop.xlane.xlu0 %574 }
  0xe2   : > { %v952_v57 = vadd.f32 %v2171_v34, %v578_v51  ;;  %v951_v58 = vadd.f32 %v2171_v34, %v575_v52  ;;  %v828_v51 = vsel %vm488_vm0, %v457_v43, 0.0  ;;  %v825_v52 = vsel %vm488_vm0, %v456_v44, 0.0 }
  0xe4   : > { %1097 = vst.msk [vmem:[%s2181_s6 + $0xe8] sm:$0xff] %vm1067_vm1, %v952_v57  ;;  %1096 = vst.msk [vmem:[%s2181_s6 + $0xe0] sm:$0xff] %vm1067_vm1, %v951_v58  ;;  %793 = vadd.xlane.f32.xlu1 %v792_v53  ;;  %790 = vadd.xlane.f32.xlu0 %v789_v54  ;;  %v459_v53 = vmul.f32 %v2360_v1, %v308_v47  ;;  %v458_v54 = vmul.f32 %v2360_v1, %v307_v48  ;;  %v310_v57 = vld [vmem:[%s1946_s29 + $0x3a8] sm:$0xff]  ;;  %v309_v58 = vld [vmem:[%s1946_s29 + $0x3a0] sm:$0xff] }
  0xe5   : > { %v584_v61 = vpop.xlane.xlu1 %583  ;;  %v581_v62 = vpop.xlane.xlu0 %580 }
  0xe6   : > { %v954_v4 = vadd.f32 %v2171_v34, %v584_v61  ;;  %v953_v5 = vadd.f32 %v2171_v34, %v581_v62  ;;  %v834_v61 = vsel %vm488_vm0, %v459_v53, 0.0  ;;  %v831_v62 = vsel %vm488_vm0, %v458_v54, 0.0 }
  0xe8   : > { %1099 = vst.msk [vmem:[%s2181_s6 + $0xf8] sm:$0xff] %vm1067_vm1, %v954_v4  ;;  %1098 = vst.msk [vmem:[%s2181_s6 + $0xf0] sm:$0xff] %vm1067_vm1, %v953_v5  ;;  %799 = vadd.xlane.f32.xlu1 %v798_v0  ;;  %796 = vadd.xlane.f32.xlu0 %v795_v63  ;;  %v461_v0 = vmul.f32 %v2360_v1, %v310_v57  ;;  %v460_v63 = vmul.f32 %v2360_v1, %v309_v58  ;;  %v312_v4 = vld [vmem:[%s1946_s29 + $0x3b8] sm:$0xff]  ;;  %v311_v5 = vld [vmem:[%s1946_s29 + $0x3b0] sm:$0xff] }
  0xe9   : > { %v590_v8 = vpop.xlane.xlu1 %589  ;;  %v587_v9 = vpop.xlane.xlu0 %586 }
  0xea   : > { %v956_v14 = vadd.f32 %v2171_v34, %v590_v8  ;;  %v955_v15 = vadd.f32 %v2171_v34, %v587_v9  ;;  %v840_v8 = vsel %vm488_vm0, %v461_v0, 0.0  ;;  %v837_v9 = vsel %vm488_vm0, %v460_v63, 0.0 }
  0xec   : > { %1101 = vst.msk [vmem:[%s2181_s6 + $0x108] sm:$0xff] %vm1067_vm1, %v956_v14  ;;  %1100 = vst.msk [vmem:[%s2181_s6 + $0x100] sm:$0xff] %vm1067_vm1, %v955_v15  ;;  %805 = vadd.xlane.f32.xlu1 %v804_v10  ;;  %802 = vadd.xlane.f32.xlu0 %v801_v11  ;;  %v463_v10 = vmul.f32 %v2360_v1, %v312_v4  ;;  %v462_v11 = vmul.f32 %v2360_v1, %v311_v5  ;;  %v314_v14 = vld [vmem:[%s1946_s29 + $0x3c8] sm:$0xff]  ;;  %v313_v15 = vld [vmem:[%s1946_s29 + $0x3c0] sm:$0xff] }
  0xed   : > { %v596_v18 = vpop.xlane.xlu1 %595  ;;  %v593_v19 = vpop.xlane.xlu0 %592 }
  0xee   : > { %v958_v24 = vadd.f32 %v2171_v34, %v596_v18  ;;  %v957_v25 = vadd.f32 %v2171_v34, %v593_v19  ;;  %v846_v18 = vsel %vm488_vm0, %v463_v10, 0.0  ;;  %v843_v19 = vsel %vm488_vm0, %v462_v11, 0.0 }
  0xf0   : > { %1103 = vst.msk [vmem:[%s2181_s6 + $0x118] sm:$0xff] %vm1067_vm1, %v958_v24  ;;  %1102 = vst.msk [vmem:[%s2181_s6 + $0x110] sm:$0xff] %vm1067_vm1, %v957_v25  ;;  %811 = vadd.xlane.f32.xlu1 %v810_v20  ;;  %808 = vadd.xlane.f32.xlu0 %v807_v21  ;;  %v465_v20 = vmul.f32 %v2360_v1, %v314_v14  ;;  %v464_v21 = vmul.f32 %v2360_v1, %v313_v15  ;;  %v316_v24 = vld [vmem:[%s1946_s29 + $0x3d8] sm:$0xff]  ;;  %v315_v25 = vld [vmem:[%s1946_s29 + $0x3d0] sm:$0xff] }
  0xf1   : > { %v602_v28 = vpop.xlane.xlu1 %601  ;;  %v599_v29 = vpop.xlane.xlu0 %598 }
  0xf2   : > { %v960_v35 = vadd.f32 %v2171_v34, %v602_v28  ;;  %v959_v36 = vadd.f32 %v2171_v34, %v599_v29  ;;  %v852_v28 = vsel %vm488_vm0, %v465_v20, 0.0  ;;  %v849_v29 = vsel %vm488_vm0, %v464_v21, 0.0 }
  0xf4   : > { %1105 = vst.msk [vmem:[%s2181_s6 + $0x128] sm:$0xff] %vm1067_vm1, %v960_v35  ;;  %1104 = vst.msk [vmem:[%s2181_s6 + $0x120] sm:$0xff] %vm1067_vm1, %v959_v36  ;;  %817 = vadd.xlane.f32.xlu1 %v816_v30  ;;  %814 = vadd.xlane.f32.xlu0 %v813_v31  ;;  %v467_v30 = vmul.f32 %v2360_v1, %v316_v24  ;;  %v466_v31 = vmul.f32 %v2360_v1, %v315_v25  ;;  %v318_v35 = vld [vmem:[%s1946_s29 + $0x3e8] sm:$0xff]  ;;  %v317_v36 = vld [vmem:[%s1946_s29 + $0x3e0] sm:$0xff] }
  0xf5   : > { %v608_v39 = vpop.xlane.xlu1 %607  ;;  %v605_v40 = vpop.xlane.xlu0 %604 }
  0xf6   : > { %v962_v45 = vadd.f32 %v2171_v34, %v608_v39  ;;  %v961_v46 = vadd.f32 %v2171_v34, %v605_v40  ;;  %v858_v39 = vsel %vm488_vm0, %v467_v30, 0.0  ;;  %v855_v40 = vsel %vm488_vm0, %v466_v31, 0.0 }
  0xf8   : > { %1107 = vst.msk [vmem:[%s2181_s6 + $0x138] sm:$0xff] %vm1067_vm1, %v962_v45  ;;  %1106 = vst.msk [vmem:[%s2181_s6 + $0x130] sm:$0xff] %vm1067_vm1, %v961_v46  ;;  %823 = vadd.xlane.f32.xlu1 %v822_v41  ;;  %820 = vadd.xlane.f32.xlu0 %v819_v42  ;;  %v469_v41 = vmul.f32 %v2360_v1, %v318_v35  ;;  %v468_v42 = vmul.f32 %v2360_v1, %v317_v36  ;;  %v320_v45 = vld [vmem:[%s1946_s29 + $0x3f8] sm:$0xff]  ;;  %v319_v46 = vld [vmem:[%s1946_s29 + $0x3f0] sm:$0xff] }
  0xf9   : > { %v614_v49 = vpop.xlane.xlu1 %613  ;;  %v611_v50 = vpop.xlane.xlu0 %610 }
  0xfa   : > { %v964_v55 = vadd.f32 %v2171_v34, %v614_v49  ;;  %v963_v56 = vadd.f32 %v2171_v34, %v611_v50  ;;  %v864_v49 = vsel %vm488_vm0, %v469_v41, 0.0  ;;  %v861_v50 = vsel %vm488_vm0, %v468_v42, 0.0 }
  0xfc   : > { %1109 = vst.msk [vmem:[%s2181_s6 + $0x148] sm:$0xff] %vm1067_vm1, %v964_v55  ;;  %1108 = vst.msk [vmem:[%s2181_s6 + $0x140] sm:$0xff] %vm1067_vm1, %v963_v56  ;;  %829 = vadd.xlane.f32.xlu1 %v828_v51  ;;  %826 = vadd.xlane.f32.xlu0 %v825_v52  ;;  %v471_v51 = vmul.f32 %v2360_v1, %v320_v45  ;;  %v470_v52 = vmul.f32 %v2360_v1, %v319_v46  ;;  %v322_v55 = vld [vmem:[%s1946_s29 + $0x408] sm:$0xff]  ;;  %v321_v56 = vld [vmem:[%s1946_s29 + $0x400] sm:$0xff] }
  0xfd   : > { %v620_v59 = vpop.xlane.xlu1 %619  ;;  %v617_v60 = vpop.xlane.xlu0 %616 }
  0xfe   : > { %v966_v2 = vadd.f32 %v2171_v34, %v620_v59  ;;  %v965_v3 = vadd.f32 %v2171_v34, %v617_v60  ;;  %v870_v59 = vsel %vm488_vm0, %v471_v51, 0.0  ;;  %v867_v60 = vsel %vm488_vm0, %v470_v52, 0.0 }
 0x100   : > { %1111 = vst.msk [vmem:[%s2181_s6 + $0x158] sm:$0xff] %vm1067_vm1, %v966_v2  ;;  %1110 = vst.msk [vmem:[%s2181_s6 + $0x150] sm:$0xff] %vm1067_vm1, %v965_v3  ;;  %835 = vadd.xlane.f32.xlu1 %v834_v61  ;;  %832 = vadd.xlane.f32.xlu0 %v831_v62  ;;  %v473_v61 = vmul.f32 %v2360_v1, %v322_v55  ;;  %v472_v62 = vmul.f32 %v2360_v1, %v321_v56  ;;  %v324_v2 = vld [vmem:[%s1946_s29 + $0x418] sm:$0xff]  ;;  %v323_v3 = vld [vmem:[%s1946_s29 + $0x410] sm:$0xff] }
 0x101   : > { %v626_v6 = vpop.xlane.xlu1 %625  ;;  %v623_v7 = vpop.xlane.xlu0 %622 }
 0x102   : > { %v968_v12 = vadd.f32 %v2171_v34, %v626_v6  ;;  %v967_v13 = vadd.f32 %v2171_v34, %v623_v7  ;;  %v876_v6 = vsel %vm488_vm0, %v473_v61, 0.0  ;;  %v873_v7 = vsel %vm488_vm0, %v472_v62, 0.0 }
 0x104   : > { %1113 = vst.msk [vmem:[%s2181_s6 + $0x168] sm:$0xff] %vm1067_vm1, %v968_v12  ;;  %1112 = vst.msk [vmem:[%s2181_s6 + $0x160] sm:$0xff] %vm1067_vm1, %v967_v13  ;;  %841 = vadd.xlane.f32.xlu1 %v840_v8  ;;  %838 = vadd.xlane.f32.xlu0 %v837_v9  ;;  %v475_v8 = vmul.f32 %v2360_v1, %v324_v2  ;;  %v474_v9 = vmul.f32 %v2360_v1, %v323_v3  ;;  %v326_v12 = vld [vmem:[%s1946_s29 + $0x428] sm:$0xff]  ;;  %v325_v13 = vld [vmem:[%s1946_s29 + $0x420] sm:$0xff] }
 0x105   : > { %v632_v16 = vpop.xlane.xlu1 %631  ;;  %v629_v17 = vpop.xlane.xlu0 %628 }
 0x106   : > { %v970_v22 = vadd.f32 %v2171_v34, %v632_v16  ;;  %v969_v23 = vadd.f32 %v2171_v34, %v629_v17  ;;  %v882_v16 = vsel %vm488_vm0, %v475_v8, 0.0  ;;  %v879_v17 = vsel %vm488_vm0, %v474_v9, 0.0 }
 0x108   : > { %1115 = vst.msk [vmem:[%s2181_s6 + $0x178] sm:$0xff] %vm1067_vm1, %v970_v22  ;;  %1114 = vst.msk [vmem:[%s2181_s6 + $0x170] sm:$0xff] %vm1067_vm1, %v969_v23  ;;  %847 = vadd.xlane.f32.xlu1 %v846_v18  ;;  %844 = vadd.xlane.f32.xlu0 %v843_v19  ;;  %v477_v18 = vmul.f32 %v2360_v1, %v326_v12  ;;  %v476_v19 = vmul.f32 %v2360_v1, %v325_v13  ;;  %v328_v22 = vld [vmem:[%s1946_s29 + $0x438] sm:$0xff]  ;;  %v327_v23 = vld [vmem:[%s1946_s29 + $0x430] sm:$0xff] }
 0x109   : > { %v638_v26 = vpop.xlane.xlu1 %637  ;;  %v635_v27 = vpop.xlane.xlu0 %634 }
 0x10a   : > { %v972_v32 = vadd.f32 %v2171_v34, %v638_v26  ;;  %v971_v33 = vadd.f32 %v2171_v34, %v635_v27  ;;  %v888_v26 = vsel %vm488_vm0, %v477_v18, 0.0  ;;  %v885_v27 = vsel %vm488_vm0, %v476_v19, 0.0 }
 0x10c   : > { %1117 = vst.msk [vmem:[%s2181_s6 + $0x188] sm:$0xff] %vm1067_vm1, %v972_v32  ;;  %1116 = vst.msk [vmem:[%s2181_s6 + $0x180] sm:$0xff] %vm1067_vm1, %v971_v33  ;;  %853 = vadd.xlane.f32.xlu1 %v852_v28  ;;  %850 = vadd.xlane.f32.xlu0 %v849_v29  ;;  %v479_v28 = vmul.f32 %v2360_v1, %v328_v22  ;;  %v478_v29 = vmul.f32 %v2360_v1, %v327_v23  ;;  %v330_v32 = vld [vmem:[%s1946_s29 + $0x448] sm:$0xff]  ;;  %v329_v33 = vld [vmem:[%s1946_s29 + $0x440] sm:$0xff] }
 0x10d   : > { %v644_v37 = vpop.xlane.xlu1 %643  ;;  %v641_v38 = vpop.xlane.xlu0 %640 }
 0x10e   : > { %v974_v43 = vadd.f32 %v2171_v34, %v644_v37  ;;  %v973_v44 = vadd.f32 %v2171_v34, %v641_v38  ;;  %v894_v37 = vsel %vm488_vm0, %v479_v28, 0.0  ;;  %v891_v38 = vsel %vm488_vm0, %v478_v29, 0.0 }
 0x110   : > { %1119 = vst.msk [vmem:[%s2181_s6 + $0x198] sm:$0xff] %vm1067_vm1, %v974_v43  ;;  %1118 = vst.msk [vmem:[%s2181_s6 + $0x190] sm:$0xff] %vm1067_vm1, %v973_v44  ;;  %859 = vadd.xlane.f32.xlu1 %v858_v39  ;;  %856 = vadd.xlane.f32.xlu0 %v855_v40  ;;  %v481_v39 = vmul.f32 %v2360_v1, %v330_v32  ;;  %v480_v40 = vmul.f32 %v2360_v1, %v329_v33  ;;  %v332_v43 = vld [vmem:[%s1946_s29 + $0x458] sm:$0xff]  ;;  %v331_v44 = vld [vmem:[%s1946_s29 + $0x450] sm:$0xff] }
 0x111   : > { %v650_v47 = vpop.xlane.xlu1 %649  ;;  %v647_v48 = vpop.xlane.xlu0 %646 }
 0x112   : > { %v976_v53 = vadd.f32 %v2171_v34, %v650_v47  ;;  %v975_v54 = vadd.f32 %v2171_v34, %v647_v48  ;;  %v900_v47 = vsel %vm488_vm0, %v481_v39, 0.0  ;;  %v897_v48 = vsel %vm488_vm0, %v480_v40, 0.0 }
 0x114   : > { %1121 = vst.msk [vmem:[%s2181_s6 + $0x1a8] sm:$0xff] %vm1067_vm1, %v976_v53  ;;  %1120 = vst.msk [vmem:[%s2181_s6 + $0x1a0] sm:$0xff] %vm1067_vm1, %v975_v54  ;;  %865 = vadd.xlane.f32.xlu1 %v864_v49  ;;  %862 = vadd.xlane.f32.xlu0 %v861_v50  ;;  %v483_v49 = vmul.f32 %v2360_v1, %v332_v43  ;;  %v482_v50 = vmul.f32 %v2360_v1, %v331_v44  ;;  %v334_v53 = vld [vmem:[%s1946_s29 + $0x468] sm:$0xff]  ;;  %v333_v54 = vld [vmem:[%s1946_s29 + $0x460] sm:$0xff] }
 0x115   : > { %v656_v57 = vpop.xlane.xlu1 %655  ;;  %v653_v58 = vpop.xlane.xlu0 %652 }
 0x116   : > { %v978_v0 = vadd.f32 %v2171_v34, %v656_v57  ;;  %v977_v63 = vadd.f32 %v2171_v34, %v653_v58  ;;  %v906_v57 = vsel %vm488_vm0, %v483_v49, 0.0  ;;  %v903_v58 = vsel %vm488_vm0, %v482_v50, 0.0 }
 0x118   : > { %1123 = vst.msk [vmem:[%s2181_s6 + $0x1b8] sm:$0xff] %vm1067_vm1, %v978_v0  ;;  %1122 = vst.msk [vmem:[%s2181_s6 + $0x1b0] sm:$0xff] %vm1067_vm1, %v977_v63  ;;  %871 = vadd.xlane.f32.xlu1 %v870_v59  ;;  %868 = vadd.xlane.f32.xlu0 %v867_v60  ;;  %v485_v59 = vmul.f32 %v2360_v1, %v334_v53  ;;  %v484_v60 = vmul.f32 %v2360_v1, %v333_v54  ;;  %v336_v0 = vld [vmem:[%s1946_s29 + $0x478] sm:$0xff]  ;;  %v335_v63 = vld [vmem:[%s1946_s29 + $0x470] sm:$0xff] }
 0x119   : > { %v662_v4 = vpop.xlane.xlu1 %661  ;;  %v659_v5 = vpop.xlane.xlu0 %658 }
 0x11a   : > { %v980_v10 = vadd.f32 %v2171_v34, %v662_v4  ;;  %v979_v11 = vadd.f32 %v2171_v34, %v659_v5  ;;  %v912_v4 = vsel %vm488_vm0, %v485_v59, 0.0  ;;  %v909_v5 = vsel %vm488_vm0, %v484_v60, 0.0 }
 0x11c   : > { %1125 = vst.msk [vmem:[%s2181_s6 + $0x1c8] sm:$0xff] %vm1067_vm1, %v980_v10  ;;  %1124 = vst.msk [vmem:[%s2181_s6 + $0x1c0] sm:$0xff] %vm1067_vm1, %v979_v11  ;;  %877 = vadd.xlane.f32.xlu1 %v876_v6  ;;  %874 = vadd.xlane.f32.xlu0 %v873_v7  ;;  %v487_v6 = vmul.f32 %v2360_v1, %v336_v0  ;;  %v486_v7 = vmul.f32 %v2360_v1, %v335_v63 }
 0x11d   : > { %v668_v14 = vpop.xlane.xlu1 %667  ;;  %v665_v15 = vpop.xlane.xlu0 %664 }
 0x11e   : > { %v982_v20 = vadd.f32 %v2171_v34, %v668_v14  ;;  %v981_v21 = vadd.f32 %v2171_v34, %v665_v15  ;;  %v918_v12 = vsel %vm488_vm0, %v487_v6, 0.0  ;;  %v915_v13 = vsel %vm488_vm0, %v486_v7, 0.0 }
 0x120   : > { %1127 = vst.msk [vmem:[%s2181_s6 + $0x1d8] sm:$0xff] %vm1067_vm1, %v982_v20  ;;  %1126 = vst.msk [vmem:[%s2181_s6 + $0x1d0] sm:$0xff] %vm1067_vm1, %v981_v21  ;;  %883 = vadd.xlane.f32.xlu1 %v882_v16  ;;  %880 = vadd.xlane.f32.xlu0 %v879_v17 }
 0x121   : > { %v674_v24 = vpop.xlane.xlu1 %673  ;;  %v671_v25 = vpop.xlane.xlu0 %670 }
 0x122   : > { %v984_v30 = vadd.f32 %v2171_v34, %v674_v24  ;;  %v983_v31 = vadd.f32 %v2171_v34, %v671_v25 }
 0x124   : > { %1129 = vst.msk [vmem:[%s2181_s6 + $0x1e8] sm:$0xff] %vm1067_vm1, %v984_v30  ;;  %1128 = vst.msk [vmem:[%s2181_s6 + $0x1e0] sm:$0xff] %vm1067_vm1, %v983_v31  ;;  %889 = vadd.xlane.f32.xlu1 %v888_v26  ;;  %886 = vadd.xlane.f32.xlu0 %v885_v27 }
 0x125   : > { %v680_v35 = vpop.xlane.xlu1 %679  ;;  %v677_v36 = vpop.xlane.xlu0 %676 }
 0x126   : > { %v986_v41 = vadd.f32 %v2171_v34, %v680_v35  ;;  %v985_v42 = vadd.f32 %v2171_v34, %v677_v36 }
 0x128   : > { %1131 = vst.msk [vmem:[%s2181_s6 + $0x1f8] sm:$0xff] %vm1067_vm1, %v986_v41  ;;  %1130 = vst.msk [vmem:[%s2181_s6 + $0x1f0] sm:$0xff] %vm1067_vm1, %v985_v42  ;;  %895 = vadd.xlane.f32.xlu1 %v894_v37  ;;  %892 = vadd.xlane.f32.xlu0 %v891_v38 }
 0x129   : > { %v686_v45 = vpop.xlane.xlu1 %685  ;;  %v683_v46 = vpop.xlane.xlu0 %682 }
 0x12a   : > { %v988_v51 = vadd.f32 %v2171_v34, %v686_v45  ;;  %v987_v52 = vadd.f32 %v2171_v34, %v683_v46 }
 0x12c   : > { %1133 = vst.msk [vmem:[%s2181_s6 + $0x208] sm:$0xff] %vm1067_vm1, %v988_v51  ;;  %1132 = vst.msk [vmem:[%s2181_s6 + $0x200] sm:$0xff] %vm1067_vm1, %v987_v52  ;;  %901 = vadd.xlane.f32.xlu1 %v900_v47  ;;  %898 = vadd.xlane.f32.xlu0 %v897_v48 }
 0x12d   : > { %v692_v55 = vpop.xlane.xlu1 %691  ;;  %v689_v56 = vpop.xlane.xlu0 %688 }
 0x12e   : > { %v990_v61 = vadd.f32 %v2171_v34, %v692_v55  ;;  %v989_v62 = vadd.f32 %v2171_v34, %v689_v56 }
 0x130   : > { %1135 = vst.msk [vmem:[%s2181_s6 + $0x218] sm:$0xff] %vm1067_vm1, %v990_v61  ;;  %1134 = vst.msk [vmem:[%s2181_s6 + $0x210] sm:$0xff] %vm1067_vm1, %v989_v62  ;;  %907 = vadd.xlane.f32.xlu1 %v906_v57  ;;  %904 = vadd.xlane.f32.xlu0 %v903_v58 }
 0x131   : > { %v698_v2 = vpop.xlane.xlu1 %697  ;;  %v695_v3 = vpop.xlane.xlu0 %694 }
 0x132   : > { %v992_v8 = vadd.f32 %v2171_v34, %v698_v2  ;;  %v991_v9 = vadd.f32 %v2171_v34, %v695_v3 }
 0x134   : > { %1137 = vst.msk [vmem:[%s2181_s6 + $0x228] sm:$0xff] %vm1067_vm1, %v992_v8  ;;  %1136 = vst.msk [vmem:[%s2181_s6 + $0x220] sm:$0xff] %vm1067_vm1, %v991_v9  ;;  %913 = vadd.xlane.f32.xlu1 %v912_v4  ;;  %910 = vadd.xlane.f32.xlu0 %v909_v5 }
 0x135   : > { %v704_v10 = vpop.xlane.xlu1 %703  ;;  %v701_v11 = vpop.xlane.xlu0 %700 }
 0x136   : > { %v994_v1 = vadd.f32 %v2171_v34, %v704_v10  ;;  %v993_v14 = vadd.f32 %v2171_v34, %v701_v11 }
 0x138   : > { %1139 = vst.msk [vmem:[%s2181_s6 + $0x238] sm:$0xff] %vm1067_vm1, %v994_v1  ;;  %1138 = vst.msk [vmem:[%s2181_s6 + $0x230] sm:$0xff] %vm1067_vm1, %v993_v14  ;;  %919 = vadd.xlane.f32.xlu1 %v918_v12  ;;  %916 = vadd.xlane.f32.xlu0 %v915_v13 }
 0x139   : > { %v710_v15 = vpop.xlane.xlu1 %709  ;;  %v707_v16 = vpop.xlane.xlu0 %706 }
 0x13a   : > { %v996_v17 = vadd.f32 %v2171_v34, %v710_v15  ;;  %v995_v18 = vadd.f32 %v2171_v34, %v707_v16 }
 0x13c   : > { %1141 = vst.msk [vmem:[%s2181_s6 + $0x248] sm:$0xff] %vm1067_vm1, %v996_v17  ;;  %1140 = vst.msk [vmem:[%s2181_s6 + $0x240] sm:$0xff] %vm1067_vm1, %v995_v18 }
 0x13d   : > { %v716_v19 = vpop.xlane.xlu1 %715  ;;  %v713_v20 = vpop.xlane.xlu0 %712 }
 0x13e   : > { %v998_v21 = vadd.f32 %v2171_v34, %v716_v19  ;;  %v997_v22 = vadd.f32 %v2171_v34, %v713_v20 }
 0x140   : > { %1143 = vst.msk [vmem:[%s2181_s6 + $0x258] sm:$0xff] %vm1067_vm1, %v998_v21  ;;  %1142 = vst.msk [vmem:[%s2181_s6 + $0x250] sm:$0xff] %vm1067_vm1, %v997_v22 }
 0x141   : > { %v722_v23 = vpop.xlane.xlu1 %721  ;;  %v719_v24 = vpop.xlane.xlu0 %718 }
 0x142   : > { %v1000_v25 = vadd.f32 %v2171_v34, %v722_v23  ;;  %v999_v26 = vadd.f32 %v2171_v34, %v719_v24 }
 0x144   : > { %1145 = vst.msk [vmem:[%s2181_s6 + $0x268] sm:$0xff] %vm1067_vm1, %v1000_v25  ;;  %1144 = vst.msk [vmem:[%s2181_s6 + $0x260] sm:$0xff] %vm1067_vm1, %v999_v26 }
 0x145   : > { %v728_v27 = vpop.xlane.xlu1 %727  ;;  %v725_v28 = vpop.xlane.xlu0 %724 }
 0x146   : > { %v1002_v29 = vadd.f32 %v2171_v34, %v728_v27  ;;  %v1001_v30 = vadd.f32 %v2171_v34, %v725_v28 }
 0x148   : > { %1147 = vst.msk [vmem:[%s2181_s6 + $0x278] sm:$0xff] %vm1067_vm1, %v1002_v29  ;;  %1146 = vst.msk [vmem:[%s2181_s6 + $0x270] sm:$0xff] %vm1067_vm1, %v1001_v30 }
 0x149   : > { %v734_v31 = vpop.xlane.xlu1 %733  ;;  %v731_v32 = vpop.xlane.xlu0 %730 }
 0x14a   : > { %v1004_v33 = vadd.f32 %v2171_v34, %v734_v31  ;;  %v1003_v35 = vadd.f32 %v2171_v34, %v731_v32 }
 0x14c   : > { %1149 = vst.msk [vmem:[%s2181_s6 + $0x288] sm:$0xff] %vm1067_vm1, %v1004_v33  ;;  %1148 = vst.msk [vmem:[%s2181_s6 + $0x280] sm:$0xff] %vm1067_vm1, %v1003_v35 }
 0x14d   : > { %v740_v36 = vpop.xlane.xlu1 %739  ;;  %v737_v37 = vpop.xlane.xlu0 %736 }
 0x14e   : > { %v1006_v38 = vadd.f32 %v2171_v34, %v740_v36  ;;  %v1005_v39 = vadd.f32 %v2171_v34, %v737_v37 }
 0x150   : > { %1151 = vst.msk [vmem:[%s2181_s6 + $0x298] sm:$0xff] %vm1067_vm1, %v1006_v38  ;;  %1150 = vst.msk [vmem:[%s2181_s6 + $0x290] sm:$0xff] %vm1067_vm1, %v1005_v39 }
 0x151   : > { %v746_v40 = vpop.xlane.xlu1 %745  ;;  %v743_v41 = vpop.xlane.xlu0 %742 }
 0x152   : > { %v1008_v42 = vadd.f32 %v2171_v34, %v746_v40  ;;  %v1007_v43 = vadd.f32 %v2171_v34, %v743_v41 }
 0x154   : > { %1153 = vst.msk [vmem:[%s2181_s6 + $0x2a8] sm:$0xff] %vm1067_vm1, %v1008_v42  ;;  %1152 = vst.msk [vmem:[%s2181_s6 + $0x2a0] sm:$0xff] %vm1067_vm1, %v1007_v43 }
 0x155   : > { %v752_v44 = vpop.xlane.xlu1 %751  ;;  %v749_v45 = vpop.xlane.xlu0 %748 }
 0x156   : > { %v1010_v46 = vadd.f32 %v2171_v34, %v752_v44  ;;  %v1009_v47 = vadd.f32 %v2171_v34, %v749_v45 }
 0x158   : > { %1155 = vst.msk [vmem:[%s2181_s6 + $0x2b8] sm:$0xff] %vm1067_vm1, %v1010_v46  ;;  %1154 = vst.msk [vmem:[%s2181_s6 + $0x2b0] sm:$0xff] %vm1067_vm1, %v1009_v47 }
 0x159   : > { %v758_v48 = vpop.xlane.xlu1 %757  ;;  %v755_v49 = vpop.xlane.xlu0 %754 }
 0x15a   : > { %v1012_v50 = vadd.f32 %v2171_v34, %v758_v48  ;;  %v1011_v51 = vadd.f32 %v2171_v34, %v755_v49 }
 0x15c   : > { %1157 = vst.msk [vmem:[%s2181_s6 + $0x2c8] sm:$0xff] %vm1067_vm1, %v1012_v50  ;;  %1156 = vst.msk [vmem:[%s2181_s6 + $0x2c0] sm:$0xff] %vm1067_vm1, %v1011_v51 }
 0x15d   : > { %v764_v52 = vpop.xlane.xlu1 %763  ;;  %v761_v53 = vpop.xlane.xlu0 %760 }
 0x15e   : > { %v1014_v54 = vadd.f32 %v2171_v34, %v764_v52  ;;  %v1013_v55 = vadd.f32 %v2171_v34, %v761_v53 }
 0x160   : > { %1159 = vst.msk [vmem:[%s2181_s6 + $0x2d8] sm:$0xff] %vm1067_vm1, %v1014_v54  ;;  %1158 = vst.msk [vmem:[%s2181_s6 + $0x2d0] sm:$0xff] %vm1067_vm1, %v1013_v55 }
 0x161   : > { %v770_v56 = vpop.xlane.xlu1 %769  ;;  %v767_v57 = vpop.xlane.xlu0 %766 }
 0x162   : > { %v1016_v58 = vadd.f32 %v2171_v34, %v770_v56  ;;  %v1015_v59 = vadd.f32 %v2171_v34, %v767_v57 }
 0x164   : > { %1161 = vst.msk [vmem:[%s2181_s6 + $0x2e8] sm:$0xff] %vm1067_vm1, %v1016_v58  ;;  %1160 = vst.msk [vmem:[%s2181_s6 + $0x2e0] sm:$0xff] %vm1067_vm1, %v1015_v59 }
 0x165   : > { %v776_v60 = vpop.xlane.xlu1 %775  ;;  %v773_v61 = vpop.xlane.xlu0 %772 }
 0x166   : > { %v1018_v62 = vadd.f32 %v2171_v34, %v776_v60  ;;  %v1017_v0 = vadd.f32 %v2171_v34, %v773_v61 }
 0x168   : > { %1163 = vst.msk [vmem:[%s2181_s6 + $0x2f8] sm:$0xff] %vm1067_vm1, %v1018_v62  ;;  %1162 = vst.msk [vmem:[%s2181_s6 + $0x2f0] sm:$0xff] %vm1067_vm1, %v1017_v0 }
 0x169   : > { %v782_v63 = vpop.xlane.xlu1 %781  ;;  %v779_v2 = vpop.xlane.xlu0 %778 }
 0x16a   : > { %v1020_v3 = vadd.f32 %v2171_v34, %v782_v63  ;;  %v1019_v4 = vadd.f32 %v2171_v34, %v779_v2 }
 0x16c   : > { %1165 = vst.msk [vmem:[%s2181_s6 + $0x308] sm:$0xff] %vm1067_vm1, %v1020_v3  ;;  %1164 = vst.msk [vmem:[%s2181_s6 + $0x300] sm:$0xff] %vm1067_vm1, %v1019_v4 }
 0x16d   : > { %v788_v5 = vpop.xlane.xlu1 %787  ;;  %v785_v6 = vpop.xlane.xlu0 %784 }
 0x16e   : > { %v1022_v7 = vadd.f32 %v2171_v34, %v788_v5  ;;  %v1021_v8 = vadd.f32 %v2171_v34, %v785_v6 }
 0x170   : > { %1167 = vst.msk [vmem:[%s2181_s6 + $0x318] sm:$0xff] %vm1067_vm1, %v1022_v7  ;;  %1166 = vst.msk [vmem:[%s2181_s6 + $0x310] sm:$0xff] %vm1067_vm1, %v1021_v8 }
 0x171   : > { %v794_v9 = vpop.xlane.xlu1 %793  ;;  %v791_v10 = vpop.xlane.xlu0 %790 }
 0x172   : > { %v1024_v11 = vadd.f32 %v2171_v34, %v794_v9  ;;  %v1023_v12 = vadd.f32 %v2171_v34, %v791_v10 }
 0x174   : > { %1169 = vst.msk [vmem:[%s2181_s6 + $0x328] sm:$0xff] %vm1067_vm1, %v1024_v11  ;;  %1168 = vst.msk [vmem:[%s2181_s6 + $0x320] sm:$0xff] %vm1067_vm1, %v1023_v12 }
 0x175   : > { %v800_v13 = vpop.xlane.xlu1 %799  ;;  %v797_v1 = vpop.xlane.xlu0 %796 }
 0x176   : > { %v1026_v14 = vadd.f32 %v2171_v34, %v800_v13  ;;  %v1025_v15 = vadd.f32 %v2171_v34, %v797_v1 }
 0x178   : > { %1171 = vst.msk [vmem:[%s2181_s6 + $0x338] sm:$0xff] %vm1067_vm1, %v1026_v14  ;;  %1170 = vst.msk [vmem:[%s2181_s6 + $0x330] sm:$0xff] %vm1067_vm1, %v1025_v15 }
 0x179   : > { %v806_v16 = vpop.xlane.xlu1 %805  ;;  %v803_v17 = vpop.xlane.xlu0 %802 }
 0x17a   : > { %v1028_v18 = vadd.f32 %v2171_v34, %v806_v16  ;;  %v1027_v19 = vadd.f32 %v2171_v34, %v803_v17 }
 0x17c   : > { %1173 = vst.msk [vmem:[%s2181_s6 + $0x348] sm:$0xff] %vm1067_vm1, %v1028_v18  ;;  %1172 = vst.msk [vmem:[%s2181_s6 + $0x340] sm:$0xff] %vm1067_vm1, %v1027_v19 }
 0x17d   : > { %v812_v20 = vpop.xlane.xlu1 %811  ;;  %v809_v21 = vpop.xlane.xlu0 %808 }
 0x17e   : > { %v1030_v22 = vadd.f32 %v2171_v34, %v812_v20  ;;  %v1029_v23 = vadd.f32 %v2171_v34, %v809_v21 }
 0x180   : > { %1175 = vst.msk [vmem:[%s2181_s6 + $0x358] sm:$0xff] %vm1067_vm1, %v1030_v22  ;;  %1174 = vst.msk [vmem:[%s2181_s6 + $0x350] sm:$0xff] %vm1067_vm1, %v1029_v23 }
 0x181   : > { %v818_v24 = vpop.xlane.xlu1 %817  ;;  %v815_v25 = vpop.xlane.xlu0 %814 }
 0x182   : > { %v1032_v26 = vadd.f32 %v2171_v34, %v818_v24  ;;  %v1031_v27 = vadd.f32 %v2171_v34, %v815_v25 }
 0x184   : > { %1177 = vst.msk [vmem:[%s2181_s6 + $0x368] sm:$0xff] %vm1067_vm1, %v1032_v26  ;;  %1176 = vst.msk [vmem:[%s2181_s6 + $0x360] sm:$0xff] %vm1067_vm1, %v1031_v27 }
 0x185   : > { %v824_v28 = vpop.xlane.xlu1 %823  ;;  %v821_v29 = vpop.xlane.xlu0 %820 }
 0x186   : > { %v1034_v30 = vadd.f32 %v2171_v34, %v824_v28  ;;  %v1033_v31 = vadd.f32 %v2171_v34, %v821_v29 }
 0x188   : > { %1179 = vst.msk [vmem:[%s2181_s6 + $0x378] sm:$0xff] %vm1067_vm1, %v1034_v30  ;;  %1178 = vst.msk [vmem:[%s2181_s6 + $0x370] sm:$0xff] %vm1067_vm1, %v1033_v31 }
 0x189   : > { %v830_v32 = vpop.xlane.xlu1 %829  ;;  %v827_v33 = vpop.xlane.xlu0 %826 }
 0x18a   : > { %v1036_v35 = vadd.f32 %v2171_v34, %v830_v32  ;;  %v1035_v36 = vadd.f32 %v2171_v34, %v827_v33 }
 0x18c   : > { %1181 = vst.msk [vmem:[%s2181_s6 + $0x388] sm:$0xff] %vm1067_vm1, %v1036_v35  ;;  %1180 = vst.msk [vmem:[%s2181_s6 + $0x380] sm:$0xff] %vm1067_vm1, %v1035_v36 }
 0x18d   : > { %v836_v37 = vpop.xlane.xlu1 %835  ;;  %v833_v38 = vpop.xlane.xlu0 %832 }
 0x18e   : > { %v1038_v39 = vadd.f32 %v2171_v34, %v836_v37  ;;  %v1037_v40 = vadd.f32 %v2171_v34, %v833_v38 }
 0x190   : > { %1183 = vst.msk [vmem:[%s2181_s6 + $0x398] sm:$0xff] %vm1067_vm1, %v1038_v39  ;;  %1182 = vst.msk [vmem:[%s2181_s6 + $0x390] sm:$0xff] %vm1067_vm1, %v1037_v40 }
 0x191   : > { %v842_v41 = vpop.xlane.xlu1 %841  ;;  %v839_v42 = vpop.xlane.xlu0 %838 }
 0x192   : > { %v1040_v43 = vadd.f32 %v2171_v34, %v842_v41  ;;  %v1039_v44 = vadd.f32 %v2171_v34, %v839_v42 }
 0x194   : > { %1185 = vst.msk [vmem:[%s2181_s6 + $0x3a8] sm:$0xff] %vm1067_vm1, %v1040_v43  ;;  %1184 = vst.msk [vmem:[%s2181_s6 + $0x3a0] sm:$0xff] %vm1067_vm1, %v1039_v44 }
 0x195   : > { %v848_v45 = vpop.xlane.xlu1 %847  ;;  %v845_v46 = vpop.xlane.xlu0 %844 }
 0x196   : > { %v1042_v47 = vadd.f32 %v2171_v34, %v848_v45  ;;  %v1041_v48 = vadd.f32 %v2171_v34, %v845_v46 }
 0x198   : > { %1187 = vst.msk [vmem:[%s2181_s6 + $0x3b8] sm:$0xff] %vm1067_vm1, %v1042_v47  ;;  %1186 = vst.msk [vmem:[%s2181_s6 + $0x3b0] sm:$0xff] %vm1067_vm1, %v1041_v48 }
 0x199   : > { %v854_v49 = vpop.xlane.xlu1 %853  ;;  %v851_v50 = vpop.xlane.xlu0 %850 }
 0x19a   : > { %v1044_v51 = vadd.f32 %v2171_v34, %v854_v49  ;;  %v1043_v52 = vadd.f32 %v2171_v34, %v851_v50 }
 0x19c   : > { %1189 = vst.msk [vmem:[%s2181_s6 + $0x3c8] sm:$0xff] %vm1067_vm1, %v1044_v51  ;;  %1188 = vst.msk [vmem:[%s2181_s6 + $0x3c0] sm:$0xff] %vm1067_vm1, %v1043_v52 }
 0x19d   : > { %v860_v53 = vpop.xlane.xlu1 %859  ;;  %v857_v54 = vpop.xlane.xlu0 %856 }
 0x19e   : > { %v1046_v55 = vadd.f32 %v2171_v34, %v860_v53  ;;  %v1045_v56 = vadd.f32 %v2171_v34, %v857_v54 }
 0x1a0   : > { %1191 = vst.msk [vmem:[%s2181_s6 + $0x3d8] sm:$0xff] %vm1067_vm1, %v1046_v55  ;;  %1190 = vst.msk [vmem:[%s2181_s6 + $0x3d0] sm:$0xff] %vm1067_vm1, %v1045_v56 }
 0x1a1   : > { %v866_v57 = vpop.xlane.xlu1 %865  ;;  %v863_v58 = vpop.xlane.xlu0 %862 }
 0x1a2   : > { %v1048_v59 = vadd.f32 %v2171_v34, %v866_v57  ;;  %v1047_v60 = vadd.f32 %v2171_v34, %v863_v58 }
 0x1a4   : > { %1193 = vst.msk [vmem:[%s2181_s6 + $0x3e8] sm:$0xff] %vm1067_vm1, %v1048_v59  ;;  %1192 = vst.msk [vmem:[%s2181_s6 + $0x3e0] sm:$0xff] %vm1067_vm1, %v1047_v60 }
 0x1a5   : > { %v872_v61 = vpop.xlane.xlu1 %871  ;;  %v869_v62 = vpop.xlane.xlu0 %868 }
 0x1a6   : > { %v1050_v0 = vadd.f32 %v2171_v34, %v872_v61  ;;  %v1049_v63 = vadd.f32 %v2171_v34, %v869_v62 }
 0x1a8   : > { %1195 = vst.msk [vmem:[%s2181_s6 + $0x3f8] sm:$0xff] %vm1067_vm1, %v1050_v0  ;;  %1194 = vst.msk [vmem:[%s2181_s6 + $0x3f0] sm:$0xff] %vm1067_vm1, %v1049_v63 }
 0x1a9   : > { %v878_v2 = vpop.xlane.xlu1 %877  ;;  %v875_v3 = vpop.xlane.xlu0 %874 }
 0x1aa   : > { %v1052_v4 = vadd.f32 %v2171_v34, %v878_v2  ;;  %v1051_v5 = vadd.f32 %v2171_v34, %v875_v3 }
 0x1ac   : > { %1197 = vst.msk [vmem:[%s2181_s6 + $0x408] sm:$0xff] %vm1067_vm1, %v1052_v4  ;;  %1196 = vst.msk [vmem:[%s2181_s6 + $0x400] sm:$0xff] %vm1067_vm1, %v1051_v5 }
 0x1ad   : > { %v884_v6 = vpop.xlane.xlu1 %883  ;;  %v881_v7 = vpop.xlane.xlu0 %880 }
 0x1ae   : > { %v1054_v8 = vadd.f32 %v2171_v34, %v884_v6  ;;  %v1053_v9 = vadd.f32 %v2171_v34, %v881_v7 }
 0x1b0   : > { %1199 = vst.msk [vmem:[%s2181_s6 + $0x418] sm:$0xff] %vm1067_vm1, %v1054_v8  ;;  %1198 = vst.msk [vmem:[%s2181_s6 + $0x410] sm:$0xff] %vm1067_vm1, %v1053_v9 }
 0x1b1   : > { %v890_v10 = vpop.xlane.xlu1 %889  ;;  %v887_v11 = vpop.xlane.xlu0 %886 }
 0x1b2   : > { %v1056_v12 = vadd.f32 %v2171_v34, %v890_v10  ;;  %v1055_v13 = vadd.f32 %v2171_v34, %v887_v11 }
 0x1b4   : > { %1201 = vst.msk [vmem:[%s2181_s6 + $0x428] sm:$0xff] %vm1067_vm1, %v1056_v12  ;;  %1200 = vst.msk [vmem:[%s2181_s6 + $0x420] sm:$0xff] %vm1067_vm1, %v1055_v13 }
 0x1b5   : > { %v896_v1 = vpop.xlane.xlu1 %895  ;;  %v893_v14 = vpop.xlane.xlu0 %892 }
 0x1b6   : > { %v1058_v15 = vadd.f32 %v2171_v34, %v896_v1  ;;  %v1057_v16 = vadd.f32 %v2171_v34, %v893_v14 }
 0x1b8   : > { %1203 = vst.msk [vmem:[%s2181_s6 + $0x438] sm:$0xff] %vm1067_vm1, %v1058_v15  ;;  %1202 = vst.msk [vmem:[%s2181_s6 + $0x430] sm:$0xff] %vm1067_vm1, %v1057_v16 }
 0x1b9   : > { %v902_v17 = vpop.xlane.xlu1 %901  ;;  %v899_v18 = vpop.xlane.xlu0 %898 }
 0x1ba   : > { %v1060_v19 = vadd.f32 %v2171_v34, %v902_v17  ;;  %v1059_v20 = vadd.f32 %v2171_v34, %v899_v18 }
 0x1bc   : > { %1205 = vst.msk [vmem:[%s2181_s6 + $0x448] sm:$0xff] %vm1067_vm1, %v1060_v19  ;;  %1204 = vst.msk [vmem:[%s2181_s6 + $0x440] sm:$0xff] %vm1067_vm1, %v1059_v20 }
 0x1bd   : > { %v908_v21 = vpop.xlane.xlu1 %907  ;;  %v905_v22 = vpop.xlane.xlu0 %904 }
 0x1be   : > { %v1062_v23 = vadd.f32 %v2171_v34, %v908_v21  ;;  %v1061_v24 = vadd.f32 %v2171_v34, %v905_v22 }
 0x1c0   : > { %1207 = vst.msk [vmem:[%s2181_s6 + $0x458] sm:$0xff] %vm1067_vm1, %v1062_v23  ;;  %1206 = vst.msk [vmem:[%s2181_s6 + $0x450] sm:$0xff] %vm1067_vm1, %v1061_v24 }
 0x1c1   : > { %v914_v25 = vpop.xlane.xlu1 %913  ;;  %v911_v26 = vpop.xlane.xlu0 %910 }
 0x1c2   : > { %v1064_v27 = vadd.f32 %v2171_v34, %v914_v25  ;;  %v1063_v28 = vadd.f32 %v2171_v34, %v911_v26  ;;  %1218 = sbr.rel (!%p1929_p4) target bundleno = 529 (0x211), region = 36 }
 0x1c4   : > { %1209 = vst.msk [vmem:[%s2181_s6 + $0x468] sm:$0xff] %vm1067_vm1, %v1064_v27  ;;  %1208 = vst.msk [vmem:[%s2181_s6 + $0x460] sm:$0xff] %vm1067_vm1, %v1063_v28 }
 0x1c5   : > { %v920_v29 = vpop.xlane.xlu1 %919  ;;  %v917_v30 = vpop.xlane.xlu0 %916 }
 0x1c6   : > { %v1066_v31 = vadd.f32 %v2171_v34, %v920_v29  ;;  %v1065_v32 = vadd.f32 %v2171_v34, %v917_v30 }
 0x1c8   : > { %1211 = vst.msk [vmem:[%s2181_s6 + $0x478] sm:$0xff] %vm1067_vm1, %v1066_v31  ;;  %1210 = vst.msk [vmem:[%s2181_s6 + $0x470] sm:$0xff] %vm1067_vm1, %v1065_v32 }
 0x1c9   : > { %s3042_s9 = smov (!%p1221_p8, %s1220_s9), 144 }
 0x1ca   : > { %s1685_s14 = sshll.u32 %s3042_s9, 7 }
 0x1cb   : > { %p1688_p9 = scmp.eq.s32.totalorder %s1685_s14, 0 }
 0x1cc   : > { %s2835_s16 = sshrl.u32 (!%p1688_p9), %s3042_s9, 6 }
 0x1cd   : > { %1229 = sbr.rel (%p1688_p9) target bundleno = 529 (0x211), region = 40  ;;  %p1689_p10 = scmp.le.s32.totalorder (!%p1688_p9), %s2835_s16, 0 }
 0x1d4   : > { %1635 = sbr.rel (%p1689_p10) target bundleno = 508 (0x1fc), region = 116  ;;  %s3033_s2 = smov (!%p1689_p10), %s2829_s13 }
 0x1d5   : > { %s3034_s18 = smov (!%p1689_p10), %s2181_s6  ;;  %s2844_s19 = smov (!%p1689_p10), 0  }
 0x1d6   : > { %s2846_s21 = smov (!%p1689_p10), 0  }
 0x1db LB: >> { %v1417_v34 = vld [vmem:[%s1855_s18] sm:$0xff]  ;;  %v1419_v33 = vld [vmem:[%s1855_s18 + $0x8] sm:$0xff]  ;;  %v1421_v35 = vld [vmem:[%s1855_s18 + $0x10] sm:$0xff]  ;;  %s1545_s22 = sadd.s32 1, %s1859_s19  ;;  %s1411_s21 = sadd.s32 1, %s1863_s21   ;;  %s1863_s21 = sphi %s2846_s21, %s1411_s21   ;;  %s1859_s19 = sphi %s2844_s19, %s3037_s19   ;;  %s1855_s18 = sphi %s3034_s18, %s3036_s18   ;;  %s1851_s2 = sphi %s3033_s2, %s3035_s2  }
 0x1dc   : >> { %1418 = vst [vmem:[%s1851_s2] sm:$0xff] %v1417_v34  ;;  %1420 = vst [vmem:[%s1851_s2 + $0x8] sm:$0xff] %v1419_v33  ;;  %v1423_v36 = vld [vmem:[%s1855_s18 + $0x18] sm:$0xff]  ;;  %v1425_v37 = vld [vmem:[%s1855_s18 + $0x20] sm:$0xff]  ;;  %p1546_p11 = scmp.ge.s32.totalorder %s1545_s22, %s2835_s16  ;;  %p1410_p12 = scmp.ge.s32.totalorder %s1411_s21, %s2835_s16 }
 0x1dd   : >> { %1422 = vst [vmem:[%s1851_s2 + $0x10] sm:$0xff] %v1421_v35  ;;  %v1427_v38 = vld [vmem:[%s1855_s18 + $0x28] sm:$0xff]  ;;  %1424 = vst [vmem:[%s1851_s2 + $0x18] sm:$0xff] %v1423_v36  ;;  %v1429_v39 = vld [vmem:[%s1855_s18 + $0x30] sm:$0xff] }
 0x1de   : >> { %1426 = vst [vmem:[%s1851_s2 + $0x20] sm:$0xff] %v1425_v37  ;;  %1428 = vst [vmem:[%s1851_s2 + $0x28] sm:$0xff] %v1427_v38  ;;  %v1431_v40 = vld [vmem:[%s1855_s18 + $0x38] sm:$0xff]  ;;  %v1433_v41 = vld [vmem:[%s1855_s18 + $0x40] sm:$0xff]  ;;  %s3044_s22 = smov (%p1546_p11, %s1545_s22), 0 }
 0x1df   : >> { %1430 = vst [vmem:[%s1851_s2 + $0x30] sm:$0xff] %v1429_v39  ;;  %1432 = vst [vmem:[%s1851_s2 + $0x38] sm:$0xff] %v1431_v40  ;;  %v1435_v42 = vld [vmem:[%s1855_s18 + $0x48] sm:$0xff]  ;;  %v1437_v43 = vld [vmem:[%s1855_s18 + $0x50] sm:$0xff]  ;;  %s1690_s23 = sshll.u32 %s3044_s22, 9  ;;  %s3037_s19 = smov %s3044_s22 }
 0x1e0   : >> { %1434 = vst [vmem:[%s1851_s2 + $0x40] sm:$0xff] %v1433_v41  ;;  %v1439_v44 = vld [vmem:[%s1855_s18 + $0x58] sm:$0xff]  ;;  %1436 = vst [vmem:[%s1851_s2 + $0x48] sm:$0xff] %v1435_v42  ;;  %v1441_v45 = vld [vmem:[%s1855_s18 + $0x60] sm:$0xff]  ;;  %s2902_s24 = scalar_lea.vmem %s2181_s6, %s1690_s23 [#allocation3]   ;;  %s2905_s25 = scalar_lea.vmem %s2829_s13, %s1690_s23  }
 0x1e1   : >> { %1438 = vst [vmem:[%s1851_s2 + $0x50] sm:$0xff] %v1437_v43  ;;  %1440 = vst [vmem:[%s1851_s2 + $0x58] sm:$0xff] %v1439_v44  ;;  %v1443_v46 = vld [vmem:[%s1855_s18 + $0x68] sm:$0xff]  ;;  %v1445_v47 = vld [vmem:[%s1855_s18 + $0x70] sm:$0xff] }
 0x1e2   : >> { %1442 = vst [vmem:[%s1851_s2 + $0x60] sm:$0xff] %v1441_v45  ;;  %1444 = vst [vmem:[%s1851_s2 + $0x68] sm:$0xff] %v1443_v46  ;;  %v1447_v48 = vld [vmem:[%s1855_s18 + $0x78] sm:$0xff]  ;;  %v1449_v49 = vld [vmem:[%s1855_s18 + $0x80] sm:$0xff] }
 0x1e3   : >> { %1446 = vst [vmem:[%s1851_s2 + $0x70] sm:$0xff] %v1445_v47  ;;  %v1451_v50 = vld [vmem:[%s1855_s18 + $0x88] sm:$0xff]  ;;  %1448 = vst [vmem:[%s1851_s2 + $0x78] sm:$0xff] %v1447_v48  ;;  %v1453_v51 = vld [vmem:[%s1855_s18 + $0x90] sm:$0xff] }
 0x1e4   : >> { %1450 = vst [vmem:[%s1851_s2 + $0x80] sm:$0xff] %v1449_v49  ;;  %1452 = vst [vmem:[%s1851_s2 + $0x88] sm:$0xff] %v1451_v50  ;;  %v1455_v52 = vld [vmem:[%s1855_s18 + $0x98] sm:$0xff]  ;;  %v1457_v53 = vld [vmem:[%s1855_s18 + $0xa0] sm:$0xff] }
 0x1e5   : >> { %1454 = vst [vmem:[%s1851_s2 + $0x90] sm:$0xff] %v1453_v51  ;;  %1456 = vst [vmem:[%s1851_s2 + $0x98] sm:$0xff] %v1455_v52  ;;  %v1459_v54 = vld [vmem:[%s1855_s18 + $0xa8] sm:$0xff]  ;;  %v1461_v55 = vld [vmem:[%s1855_s18 + $0xb0] sm:$0xff] }
 0x1e6   : >> { %1458 = vst [vmem:[%s1851_s2 + $0xa0] sm:$0xff] %v1457_v53  ;;  %v1463_v56 = vld [vmem:[%s1855_s18 + $0xb8] sm:$0xff]  ;;  %1460 = vst [vmem:[%s1851_s2 + $0xa8] sm:$0xff] %v1459_v54  ;;  %v1465_v57 = vld [vmem:[%s1855_s18 + $0xc0] sm:$0xff] }
 0x1e7   : >> { %1462 = vst [vmem:[%s1851_s2 + $0xb0] sm:$0xff] %v1461_v55  ;;  %1464 = vst [vmem:[%s1851_s2 + $0xb8] sm:$0xff] %v1463_v56  ;;  %v1467_v58 = vld [vmem:[%s1855_s18 + $0xc8] sm:$0xff]  ;;  %v1469_v59 = vld [vmem:[%s1855_s18 + $0xd0] sm:$0xff] }
 0x1e8   : >> { %1466 = vst [vmem:[%s1851_s2 + $0xc0] sm:$0xff] %v1465_v57  ;;  %1468 = vst [vmem:[%s1851_s2 + $0xc8] sm:$0xff] %v1467_v58  ;;  %v1471_v60 = vld [vmem:[%s1855_s18 + $0xd8] sm:$0xff]  ;;  %v1473_v61 = vld [vmem:[%s1855_s18 + $0xe0] sm:$0xff] }
 0x1e9   : >> { %1470 = vst [vmem:[%s1851_s2 + $0xd0] sm:$0xff] %v1469_v59  ;;  %v1475_v62 = vld [vmem:[%s1855_s18 + $0xe8] sm:$0xff]  ;;  %1472 = vst [vmem:[%s1851_s2 + $0xd8] sm:$0xff] %v1471_v60  ;;  %v1477_v0 = vld [vmem:[%s1855_s18 + $0xf0] sm:$0xff] }
 0x1ea   : >> { %1474 = vst [vmem:[%s1851_s2 + $0xe0] sm:$0xff] %v1473_v61  ;;  %1476 = vst [vmem:[%s1851_s2 + $0xe8] sm:$0xff] %v1475_v62  ;;  %v1479_v63 = vld [vmem:[%s1855_s18 + $0xf8] sm:$0xff]  ;;  %v1481_v2 = vld [vmem:[%s1855_s18 + $0x100] sm:$0xff] }
 0x1eb   : >> { %1478 = vst [vmem:[%s1851_s2 + $0xf0] sm:$0xff] %v1477_v0  ;;  %1480 = vst [vmem:[%s1851_s2 + $0xf8] sm:$0xff] %v1479_v63  ;;  %v1483_v3 = vld [vmem:[%s1855_s18 + $0x108] sm:$0xff]  ;;  %v1485_v4 = vld [vmem:[%s1855_s18 + $0x110] sm:$0xff] }
 0x1ec   : >> { %1482 = vst [vmem:[%s1851_s2 + $0x100] sm:$0xff] %v1481_v2  ;;  %v1487_v5 = vld [vmem:[%s1855_s18 + $0x118] sm:$0xff]  ;;  %1484 = vst [vmem:[%s1851_s2 + $0x108] sm:$0xff] %v1483_v3  ;;  %v1489_v6 = vld [vmem:[%s1855_s18 + $0x120] sm:$0xff] }
 0x1ed   : >> { %1486 = vst [vmem:[%s1851_s2 + $0x110] sm:$0xff] %v1485_v4  ;;  %1488 = vst [vmem:[%s1851_s2 + $0x118] sm:$0xff] %v1487_v5  ;;  %v1491_v7 = vld [vmem:[%s1855_s18 + $0x128] sm:$0xff]  ;;  %v1493_v8 = vld [vmem:[%s1855_s18 + $0x130] sm:$0xff] }
 0x1ee   : >> { %1490 = vst [vmem:[%s1851_s2 + $0x120] sm:$0xff] %v1489_v6  ;;  %1492 = vst [vmem:[%s1851_s2 + $0x128] sm:$0xff] %v1491_v7  ;;  %v1495_v9 = vld [vmem:[%s1855_s18 + $0x138] sm:$0xff]  ;;  %v1497_v10 = vld [vmem:[%s1855_s18 + $0x140] sm:$0xff] }
 0x1ef   : >> { %1494 = vst [vmem:[%s1851_s2 + $0x130] sm:$0xff] %v1493_v8  ;;  %v1499_v11 = vld [vmem:[%s1855_s18 + $0x148] sm:$0xff]  ;;  %1496 = vst [vmem:[%s1851_s2 + $0x138] sm:$0xff] %v1495_v9  ;;  %v1501_v12 = vld [vmem:[%s1855_s18 + $0x150] sm:$0xff] }
 0x1f0   : >> { %1498 = vst [vmem:[%s1851_s2 + $0x140] sm:$0xff] %v1497_v10  ;;  %1500 = vst [vmem:[%s1851_s2 + $0x148] sm:$0xff] %v1499_v11  ;;  %v1503_v13 = vld [vmem:[%s1855_s18 + $0x158] sm:$0xff]  ;;  %v1505_v1 = vld [vmem:[%s1855_s18 + $0x160] sm:$0xff] }
 0x1f1   : >> { %1502 = vst [vmem:[%s1851_s2 + $0x150] sm:$0xff] %v1501_v12  ;;  %1504 = vst [vmem:[%s1851_s2 + $0x158] sm:$0xff] %v1503_v13  ;;  %v1507_v14 = vld [vmem:[%s1855_s18 + $0x168] sm:$0xff]  ;;  %v1509_v15 = vld [vmem:[%s1855_s18 + $0x170] sm:$0xff] }
 0x1f2   : >> { %1506 = vst [vmem:[%s1851_s2 + $0x160] sm:$0xff] %v1505_v1  ;;  %v1511_v16 = vld [vmem:[%s1855_s18 + $0x178] sm:$0xff]  ;;  %1508 = vst [vmem:[%s1851_s2 + $0x168] sm:$0xff] %v1507_v14  ;;  %v1513_v17 = vld [vmem:[%s1855_s18 + $0x180] sm:$0xff] }
 0x1f3   : >> { %1510 = vst [vmem:[%s1851_s2 + $0x170] sm:$0xff] %v1509_v15  ;;  %1512 = vst [vmem:[%s1851_s2 + $0x178] sm:$0xff] %v1511_v16  ;;  %v1515_v18 = vld [vmem:[%s1855_s18 + $0x188] sm:$0xff]  ;;  %v1517_v19 = vld [vmem:[%s1855_s18 + $0x190] sm:$0xff] }
 0x1f4   : >> { %1514 = vst [vmem:[%s1851_s2 + $0x180] sm:$0xff] %v1513_v17  ;;  %1516 = vst [vmem:[%s1851_s2 + $0x188] sm:$0xff] %v1515_v18  ;;  %v1519_v20 = vld [vmem:[%s1855_s18 + $0x198] sm:$0xff]  ;;  %v1521_v21 = vld [vmem:[%s1855_s18 + $0x1a0] sm:$0xff] }
 0x1f5   : >> { %1518 = vst [vmem:[%s1851_s2 + $0x190] sm:$0xff] %v1517_v19  ;;  %v1523_v22 = vld [vmem:[%s1855_s18 + $0x1a8] sm:$0xff]  ;;  %1520 = vst [vmem:[%s1851_s2 + $0x198] sm:$0xff] %v1519_v20  ;;  %v1525_v23 = vld [vmem:[%s1855_s18 + $0x1b0] sm:$0xff]  ;;  %1413 = sbr.rel (!%p1410_p12) target bundleno = 475 (0x1db), region = 122 }
 0x1f6   : >> { %1522 = vst [vmem:[%s1851_s2 + $0x1a0] sm:$0xff] %v1521_v21  ;;  %1524 = vst [vmem:[%s1851_s2 + $0x1a8] sm:$0xff] %v1523_v22  ;;  %v1527_v24 = vld [vmem:[%s1855_s18 + $0x1b8] sm:$0xff]  ;;  %v1529_v25 = vld [vmem:[%s1855_s18 + $0x1c0] sm:$0xff] }
 0x1f7   : >> { %1526 = vst [vmem:[%s1851_s2 + $0x1b0] sm:$0xff] %v1525_v23  ;;  %1528 = vst [vmem:[%s1851_s2 + $0x1b8] sm:$0xff] %v1527_v24  ;;  %v1531_v26 = vld [vmem:[%s1855_s18 + $0x1c8] sm:$0xff]  ;;  %v1533_v27 = vld [vmem:[%s1855_s18 + $0x1d0] sm:$0xff] }
 0x1f8   : >> { %1530 = vst [vmem:[%s1851_s2 + $0x1c0] sm:$0xff] %v1529_v25  ;;  %v1535_v28 = vld [vmem:[%s1855_s18 + $0x1d8] sm:$0xff]  ;;  %1532 = vst [vmem:[%s1851_s2 + $0x1c8] sm:$0xff] %v1531_v26  ;;  %v1537_v29 = vld [vmem:[%s1855_s18 + $0x1e0] sm:$0xff] }
 0x1f9   : >> { %1534 = vst [vmem:[%s1851_s2 + $0x1d0] sm:$0xff] %v1533_v27  ;;  %1536 = vst [vmem:[%s1851_s2 + $0x1d8] sm:$0xff] %v1535_v28  ;;  %v1539_v30 = vld [vmem:[%s1855_s18 + $0x1e8] sm:$0xff]  ;;  %v1541_v31 = vld [vmem:[%s1855_s18 + $0x1f0] sm:$0xff] }
 0x1fa   : >> { %1538 = vst [vmem:[%s1851_s2 + $0x1e0] sm:$0xff] %v1537_v29  ;;  %1540 = vst [vmem:[%s1851_s2 + $0x1e8] sm:$0xff] %v1539_v30  ;;  %v1543_v32 = vld [vmem:[%s1855_s18 + $0x1f8] sm:$0xff]  ;;  %s3036_s18 = smov %s2902_s24 }
 0x1fb   : >> { %1542 = vst [vmem:[%s1851_s2 + $0x1f0] sm:$0xff] %v1541_v31  ;;  %1544 = vst [vmem:[%s1851_s2 + $0x1f8] sm:$0xff] %v1543_v32  ;;  %s3035_s2 = smov %s2905_s25 }
 0x1fc PF: > { %s3010_s26 = sand.u32 63, %s3042_s9   ;;  %s1701_s27 = sshll.u32 %s2835_s16, 9 }
 0x1fd   : > { %s1556_s28 = scalar_lea.vmem %s2181_s6, %s1701_s27 [#allocation3]   ;;  %s1558_s29 = scalar_lea.vmem %s2829_s13, %s1701_s27  }
 0x1fe   : > { %p1695_p13 = scmp.le.s32.totalorder %s3010_s26, 0 }
 0x1ff   : > { %s1865_s30 = smov (!%p1695_p13), %s1558_s29   ;;  %s1869_s4 = smov (!%p1695_p13), %s1556_s28  }
 0x200   : > { %1649 = sbr.rel (%p1695_p13) target bundleno = 529 (0x211), region = 127  ;;  %s1873_s5 = smov (!%p1695_p13), 0  }
 0x201   : > { %s1877_s7 = smov (!%p1695_p13), 0  }
 0x207 LB: >> { %v1568_v34 = vld [vmem:[%s1871_s4] sm:$0xff]  ;;  %s1570_s8 = sadd.s32 1, %s1875_s5  ;;  %s1562_s7 = sadd.s32 1, %s1879_s7   ;;  %s1879_s7 = sphi %s1877_s7, %s1562_s7   ;;  %s1875_s5 = sphi %s1873_s5, %s1874_s5   ;;  %s1871_s4 = sphi %s1869_s4, %s1575_s4   ;;  %s1867_s30 = sphi %s1865_s30, %s1576_s30  }
 0x208   : >> { %1569 = vst [vmem:[%s1867_s30] sm:$0xff] %v1568_v34  ;;  %p1571_p0 = scmp.ge.s32.totalorder %s1570_s8, %s3010_s26  ;;  %p1561_p1 = scmp.ge.s32.totalorder %s1562_s7, %s3010_s26 }
 0x20a   : >> { %s3046_s8 = smov (%p1571_p0, %s1570_s8), 0  ;;  %1564 = sbr.rel (!%p1561_p1) target bundleno = 519 (0x207), region = 133 }
 0x20b   : >> { %s1696_s6 = sshll.u32 %s3046_s8, 3  ;;  %s1874_s5 = smov %s3046_s8  }
 0x20c   : >> { %s1575_s4 = scalar_lea.vmem %s1556_s28, %s1696_s6 [#allocation3]   ;;  %s1576_s30 = scalar_lea.vmem %s1558_s29, %s1696_s6  }
 0x211 PF: > { %p11_p2 = scmp.ge.s32.totalorder %s1919_s17, 5   ;;  %s3038_s14 = smov %s1843_s15 }
 0x212   : > { %s3039_s15 = smov %s1927_s20  ;;  %s3040_s16 = smov %s1919_s17 }
 0x213   :  { %13 = sbr.rel (!%p11_p2) target bundleno = 4 (0x4), region = 144 }

</bundles_post_ra>
